<compile_context>
chip_gen: v7x
topology: tpu7x:2x2x1
jax: 0.10.0
libtpu: 0.0.40
codegen_flags: <defaults>
</compile_context>

<pallas_src>
import math

import jax
import jax.numpy as jnp
from jax import lax
from jax.experimental import pallas as pl
from jax.experimental.pallas import tpu as pltpu

# ---------------- hyper-parameters (small, consistent with the module) -------
INPUT_DIM   = 3            # raw feature dim
EMBED_TIME  = 5            # must equal the hard-coded "5" of linears[2] (RNN input)
NUM_HEADS   = 1
INIT_EMBED  = 8
OUT_CLASSES = 5
ATT_OUT     = 5            # MultiTimeAttention.linears[2] output width (hard-coded)

B, T, Q = 2, 8, 10         # batch, observed seq len, number of query time points
D = 2 * INPUT_DIM          # feature dim after torch.cat((x, mask), 2)
QPAD = ((Q + 7) // 8) * 8  # queries padded to a sublane-aligned row count
WP = INIT_EMBED * OUT_CLASSES   # 40 = widest parameter row (final layer)

assert EMBED_TIME % NUM_HEADS == 0
assert EMBED_TIME == ATT_OUT   # required for the PyTorch forward to be runnable


# -------------------------------- kernel -------------------------------------
def mtan_kernel(x_ref, m_ref, t_ref, p_ref, out_ref):
    et, idim, nq, nb, tl = EMBED_TIME, INPUT_DIM, Q, B, T

    # ---- unpack the single packed parameter slab (all static slices) --------
    P = p_ref[...]                                  # (37, 40) f32
    te_w = P[0:1, 0:et]                             # time-embedding weight
    te_b = P[1:2, 0:et]                             # time-embedding bias
    b0s  = P[2:3, 0:et]                             # linears[0] bias (pre-scaled)
    b1   = P[3:4, 0:et]                             # linears[1] bias
    b2ih = P[4:5, 0:et]                             # b2@Wih + b_ih + b_hh
    beff = P[5:6, :]                                # folded classifier+final bias (1, 40)
    wqk  = P[8:13, 0:2 * et]                        # [w0*inv_sqrt | w1]  (et, 2*et)
    w2ih = P[16:22, 0:et]                           # w2 @ wih            (2*idim, et)
    whh  = P[24:29, 0:et]                           # Whh^T               (et, et)
    weff = P[32:37, :]                              # folded classifier+final weight (et, 40)

    # ---- time embedding + fused q/k projections: ONE matmul -----------------
    # rows 0:Q are query times, rows QPAD:QPAD+B*T are key times (b*T + t).
    tcol = t_ref[...]                               # (QPAD + B*T, 1)
    pre = tcol * te_w + te_b                        # (QPAD + B*T, et)
    lane = lax.broadcasted_iota(jnp.int32, pre.shape, 1)
    emb = jnp.where(lane == 0, pre, jnp.sin(pre))   # [linear | sin(periodic)]
    proj = jnp.dot(emb, wqk, preferred_element_type=jnp.float32)   # (QPAD+B*T, 2*et)
    q_proj = proj[0:nq, 0:et] + b0s                 # (Q, et), 1/sqrt(d_k) folded in
    k_proj = proj[QPAD:QPAD + nb * tl, et:2 * et] + b1              # (B*T, et)

    # ---- attention scores: ONE dot_general, no permutation matmul -----------
    s = lax.dot_general(k_proj, q_proj, (((1,), (1,)), ((), ())),
                        preferred_element_type=jnp.float32)         # (B*T, Q)
    # replicate along lanes for the 3 raw features (score is d-independent):
    # columns are d*Q + q, rows are b*T + t  -> T stays on sublanes.
    s3 = jnp.concatenate([s, s, s], axis=1)          # (B*T, 3*Q)

    x_all = x_ref[...]                               # (B*T, 3*Q) value (x half)
    m_all = m_ref[...]                               # (B*T, 3*Q) mask (and mask half value)
    sm = jnp.where(m_all == 0.0, -1000000000.0, s3)

    # ---- fused masked softmax over time (sublane reduce), per batch slab ----
    ox_rows, om_rows = [], []
    for b in range(nb):
        sl = slice(b * tl, (b + 1) * tl)
        sb, xb, mb = sm[sl], x_all[sl], m_all[sl]                    # (T, 3*Q)
        pw = jnp.exp(sb - jnp.max(sb, axis=0, keepdims=True))        # (T, 3*Q)
        rden = pl.reciprocal(jnp.sum(pw, axis=0, keepdims=True), approx=True)
        ox_rows.append(jnp.sum(pw * xb, axis=0, keepdims=True) * rden)   # (1, 3*Q)
        om_rows.append(jnp.sum(pw * mb, axis=0, keepdims=True) * rden)   # (1, 3*Q)
    oxn = jnp.concatenate(ox_rows, axis=0)           # (B, 3*Q), cols d*Q + q
    omn = jnp.concatenate(om_rows, axis=0)           # (B, 3*Q)

    # ---- attention out-proj + RNN recurrence: all VPU broadcast-FMAs --------
    w2rows  = [jnp.broadcast_to(w2ih[j:j + 1, :], (nb, et)) for j in range(2 * idim)]
    whhrows = [jnp.broadcast_to(whh[k:k + 1, :], (nb, et)) for k in range(et)]
    bstep   = jnp.broadcast_to(b2ih, (nb, et))

    h = jnp.zeros((nb, et), jnp.float32)
    for step in range(nq):                            # fully unrolled, Q = 10
        # RNN input for this step (independent of h -> overlaps with the chain)
        x_q = bstep
        for d in range(idim):
            c = d * nq + step
            x_q = x_q + oxn[:, c:c + 1] * w2rows[d]          # x-half of the value
            x_q = x_q + omn[:, c:c + 1] * w2rows[idim + d]   # mask-half of the value
        # h @ Whh^T as et broadcast-FMAs (no MXU on the serial chain)
        acc = x_q
        for k in range(et):
            acc = acc + h[:, k:k + 1] * whhrows[k]
        h = jnp.tanh(acc)

    # ---- classifier + final (folded) as et FMAs + bias; single (B, 40) store
    out = jnp.broadcast_to(beff, (nb, WP))
    for k in range(et):
        out = out + h[:, k:k + 1] * jnp.broadcast_to(weff[k:k + 1, :], (nb, WP))
    out_ref[...] = out


# ------------------------------ parameters -----------------------------------
def init_params(key):
    """Deterministic synthetic params. Linear weights are stored TRANSPOSED
    (in_features, out_features) so kernels do x @ W_t + b (== torch x @ W.T + b)."""
    def lin(k, fan_in, fan_out):
        k1, k2 = jax.random.split(k)
        bound = 1.0 / math.sqrt(fan_in)
        wt = jax.random.uniform(k1, (fan_in, fan_out), jnp.float32, -bound, bound)
        b = jax.random.uniform(k2, (1, fan_out), jnp.float32, -bound, bound)
        return wt, b

    keys = jax.random.split(key, 9)
    p = {}
    p['w_lin'], p['b_lin'] = lin(keys[0], 1, 1)                       # self.linear
    p['w_per'], p['b_per'] = lin(keys[1], 1, EMBED_TIME - 1)          # self.periodic
    p['w0'], p['b0'] = lin(keys[2], EMBED_TIME, EMBED_TIME)           # att.linears[0]
    p['w1'], p['b1'] = lin(keys[3], EMBED_TIME, EMBED_TIME)           # att.linears[1]
    p['w2'], p['b2'] = lin(keys[4], D * NUM_HEADS, ATT_OUT)           # att.linears[2]
    p['wih'], p['bih'] = lin(keys[5], EMBED_TIME, EMBED_TIME)         # enc W_ih / b_ih
    p['whh'], p['bhh'] = lin(keys[6], EMBED_TIME, EMBED_TIME)         # enc W_hh / b_hh
    p['wc'], p['bc'] = lin(keys[7], 1, OUT_CLASSES)                   # classifier
    p['wf'], p['bf'] = lin(keys[8], EMBED_TIME * OUT_CLASSES,         # final
                           INIT_EMBED * OUT_CLASSES)
    return p


# ------------------------------- wrapper --------------------------------------
@jax.jit
def mtan_forward(x, time_steps, mask, query_times, params):
    bsz, tlen, in_dim = x.shape
    nq = query_times.shape[0]
    assert (bsz, tlen, in_dim, nq) == (B, T, INPUT_DIM, Q)
    et, oc = EMBED_TIME, OUT_CLASSES

    # ---- data slabs: rows = b*T + t (sublanes), cols = d*Q + q (lanes) -------
    x_rep = jnp.broadcast_to(x.reshape(bsz * tlen, in_dim, 1).astype(jnp.float32),
                             (bsz * tlen, in_dim, nq)).reshape(bsz * tlen, in_dim * nq)
    m_rep = jnp.broadcast_to(mask.reshape(bsz * tlen, in_dim, 1).astype(jnp.float32),
                             (bsz * tlen, in_dim, nq)).reshape(bsz * tlen, in_dim * nq)
    tcol = jnp.concatenate([query_times.reshape(nq, 1),
                            jnp.zeros((QPAD - nq, 1), jnp.float32),
                            time_steps.reshape(bsz * tlen, 1)],
                           axis=0).astype(jnp.float32)                # (QPAD + B*T, 1)

    # ---- parameter folding (tiny, done once by XLA outside the kernel) ------
    inv_sqrt = 1.0 / math.sqrt(et // NUM_HEADS)
    te_w = jnp.concatenate([params['w_lin'], params['w_per']], axis=1)    # (1, et)
    te_b = jnp.concatenate([params['b_lin'], params['b_per']], axis=1)    # (1, et)
    w0s = params['w0'] * inv_sqrt                                         # fold 1/sqrt(d_k)
    b0s = params['b0'] * inv_sqrt
    wqk = jnp.concatenate([w0s, params['w1']], axis=1)                    # (et, 2*et)
    w2ih = params['w2'] @ params['wih']                                   # (D, et)
    b2ih = params['b2'] @ params['wih'] + params['bih'] + params['bhh']   # (1, et)
    wf3 = params['wf'].reshape(et, oc, INIT_EMBED * OUT_CLASSES)          # wf[j*oc+c] = wf3[j,c]
    weff = jnp.einsum('c,jcf->jf', params['wc'][0], wf3)                  # (et, 40)
    beff = params['bf'] + jnp.einsum('c,jcf->f', params['bc'][0], wf3)[None, :]

    # ---- pack ALL parameters into one pre-padded slab -----------------------
    def padw(a):
        return jnp.pad(a.astype(jnp.float32), ((0, 0), (0, WP - a.shape[1])))
    pslab = jnp.concatenate([
        padw(te_w), padw(te_b), padw(b0s), padw(params['b1']), padw(b2ih), padw(beff),
        jnp.zeros((2, WP), jnp.float32),                   # rows 0-7  : 1-row vectors
        padw(wqk), jnp.zeros((3, WP), jnp.float32),        # rows 8-15 : wqk
        padw(w2ih), jnp.zeros((2, WP), jnp.float32),       # rows 16-23: w2ih
        padw(params['whh']), jnp.zeros((3, WP), jnp.float32),  # rows 24-31: whh
        padw(weff),                                        # rows 32-36: weff
    ], axis=0)                                             # (37, 40)

    vmem = pl.BlockSpec(memory_space=pltpu.MemorySpace.VMEM)
    out = pl.pallas_call(
        mtan_kernel,
        out_shape=jax.ShapeDtypeStruct((bsz, INIT_EMBED * OUT_CLASSES), jnp.float32),
        in_specs=[vmem, vmem, vmem, vmem],
        out_specs=vmem,
    )(x_rep, m_rep, tcol, pslab)
    return out.reshape(bsz, INIT_EMBED, OUT_CLASSES)


# ------------------------ pure-JAX reference (for checking) -------------------
def mtan_reference(x, time_steps, mask, query_times, p):
    x_cat = jnp.concatenate([x, mask], axis=2)
    mask_cat = jnp.concatenate([mask, mask], axis=2)

    def time_emb(tt):
        tt = tt[..., None]
        out1 = tt * p['w_lin'][0, 0] + p['b_lin'][0, 0]
        out2 = jnp.sin(tt * p['w_per'][0] + p['b_per'][0])
        return jnp.concatenate([out1, out2], axis=-1)

    key = time_emb(time_steps)                          # (B, T, et)
    query = time_emb(query_times[None, :])              # (1, Q, et)
    q_proj = query[0] @ p['w0'] + p['b0']               # (Q, et)  (num_heads == 1)
    k_proj = key @ p['w1'] + p['b1']                    # (B, T, et)
    d_k = EMBED_TIME // NUM_HEADS
    scores = jnp.einsum('qe,bte->bqt', q_proj, k_proj) / math.sqrt(d_k)
    scores = scores[..., None]                          # (B, Q, T, 1) -> broadcast over D
    scores = jnp.where(mask_cat[:, None, :, :] == 0, -1000000000.0, scores)
    p_attn = jax.nn.softmax(scores, axis=2)             # softmax over time
    att = jnp.sum(p_attn * x_cat[:, None, :, :], axis=2)          # (B, Q, D)
    att = att @ p['w2'] + p['b2']                        # (B, Q, 5)

    h = jnp.zeros((x.shape[0], EMBED_TIME), jnp.float32)
    for step in range(att.shape[1]):
        h = jnp.tanh(att[:, step, :] @ p['wih'] + p['bih'] + h @ p['whh'] + p['bhh'])

    cls = h[:, :, None] * p['wc'][0][None, None, :] + p['bc'][0][None, None, :]
    flat = cls.reshape(x.shape[0], EMBED_TIME * OUT_CLASSES)
    out = flat @ p['wf'] + p['bf']
    return out.reshape(x.shape[0], INIT_EMBED, OUT_CLASSES)


# --------------------------------- main ---------------------------------------
if __name__ == "__main__":
    root = jax.random.PRNGKey(0)
    kp, kx, km, kt = jax.random.split(root, 4)

    params = init_params(kp)
    x = jax.random.normal(kx, (B, T, INPUT_DIM), dtype=jnp.float32)
    mask = (jax.random.uniform(km, (B, T, INPUT_DIM)) > 0.3).astype(jnp.float32)
    time_steps = jnp.sort(jax.random.uniform(kt, (B, T)), axis=1).astype(jnp.float32)
    query_times = jnp.linspace(0.0, 1.0, Q, dtype=jnp.float32)

    out = mtan_forward(x, time_steps, mask, query_times, params)
    out = jax.block_until_ready(out)

    ref = mtan_reference(x, time_steps, mask, query_times, params)
    assert out.shape == (B, INIT_EMBED, OUT_CLASSES), out.shape
    max_err = float(jnp.max(jnp.abs(out - ref)))
    # Tolerance is dominated by the approximate EUP reciprocal used for the
    # softmax normalization (requested by the perf review); everything else
    # matches the reference to ~1e-5.
    if max_err > 5e-3:
        raise AssertionError(f"kernel mismatch vs reference, max_err={max_err}")
    print("KERNEL_OK")
</pallas_src>

<mosaic_0001>
module attributes {stable_mosaic.version = 11 : i64} {
  func.func @mtan_kernel(%arg0: memref<16x30xf32, #tpu.memory_space<vmem>>, %arg1: memref<16x30xf32, #tpu.memory_space<vmem>>, %arg2: memref<32x1xf32, #tpu.memory_space<vmem>>, %arg3: memref<37x40xf32, #tpu.memory_space<vmem>>, %arg4: memref<2x40xf32, #tpu.memory_space<vmem>>) attributes {dimension_semantics = [], scalar_prefetch = 0 : i64, scratch_operands = 0 : i64, tpu.core_type = #tpu.core_type<tc>} {
    %c0 = arith.constant 0 : index
    %c0_0 = arith.constant 0 : index
    %0 = vector.load %arg3[%c0, %c0_0] : memref<37x40xf32, #tpu.memory_space<vmem>>, vector<37x40xf32>
    %1 = vector.extract_strided_slice %0 {offsets = [0, 0], sizes = [1, 5], strides = [1, 1]} : vector<37x40xf32> to vector<1x5xf32>
    %2 = vector.extract_strided_slice %0 {offsets = [1, 0], sizes = [1, 5], strides = [1, 1]} : vector<37x40xf32> to vector<1x5xf32>
    %3 = vector.extract_strided_slice %0 {offsets = [2, 0], sizes = [1, 5], strides = [1, 1]} : vector<37x40xf32> to vector<1x5xf32>
    %4 = vector.extract_strided_slice %0 {offsets = [3, 0], sizes = [1, 5], strides = [1, 1]} : vector<37x40xf32> to vector<1x5xf32>
    %5 = vector.extract_strided_slice %0 {offsets = [4, 0], sizes = [1, 5], strides = [1, 1]} : vector<37x40xf32> to vector<1x5xf32>
    %6 = vector.extract_strided_slice %0 {offsets = [5, 0], sizes = [1, 40], strides = [1, 1]} : vector<37x40xf32> to vector<1x40xf32>
    %7 = vector.extract_strided_slice %0 {offsets = [8, 0], sizes = [5, 10], strides = [1, 1]} : vector<37x40xf32> to vector<5x10xf32>
    %8 = vector.extract_strided_slice %0 {offsets = [16, 0], sizes = [6, 5], strides = [1, 1]} : vector<37x40xf32> to vector<6x5xf32>
    %9 = vector.extract_strided_slice %0 {offsets = [24, 0], sizes = [5, 5], strides = [1, 1]} : vector<37x40xf32> to vector<5x5xf32>
    %10 = vector.extract_strided_slice %0 {offsets = [32, 0], sizes = [5, 40], strides = [1, 1]} : vector<37x40xf32> to vector<5x40xf32>
    %c0_1 = arith.constant 0 : index
    %c0_2 = arith.constant 0 : index
    %11 = vector.load %arg2[%c0_1, %c0_2] : memref<32x1xf32, #tpu.memory_space<vmem>>, vector<32x1xf32>
    %12 = vector.broadcast %11 : vector<32x1xf32> to vector<32x5xf32>
    %13 = vector.broadcast %1 : vector<1x5xf32> to vector<32x5xf32>
    %14 = arith.mulf %12, %13 : vector<32x5xf32>
    %15 = vector.broadcast %2 : vector<1x5xf32> to vector<32x5xf32>
    %16 = arith.addf %14, %15 : vector<32x5xf32>
    %17 = tpu.iota {dimensions = array<i32: 1>} : vector<32x5xi32>
    %c0_i32 = arith.constant 0 : i32
    %18 = vector.broadcast %c0_i32 : i32 to vector<32x5xi32>
    %19 = arith.cmpi eq, %17, %18 : vector<32x5xi32>
    %20 = math.sin %16 : vector<32x5xf32>
    %21 = arith.select %19, %16, %20 : vector<32x5xi1>, vector<32x5xf32>
    %cst = arith.constant dense<0.000000e+00> : vector<32x10xf32>
    %22 = tpu.matmul %21, %7, %cst {dimension_numbers = #tpu.dot_dimension_numbers<[1], [0], [0], [1], [0, 0, 1, 1], [], []>} : vector<32x5xf32>, vector<5x10xf32>, vector<32x10xf32> -> vector<32x10xf32>
    %23 = vector.extract_strided_slice %22 {offsets = [0, 0], sizes = [10, 5], strides = [1, 1]} : vector<32x10xf32> to vector<10x5xf32>
    %24 = vector.broadcast %3 : vector<1x5xf32> to vector<10x5xf32>
    %25 = arith.addf %23, %24 : vector<10x5xf32>
    %26 = vector.extract_strided_slice %22 {offsets = [16, 5], sizes = [16, 5], strides = [1, 1]} : vector<32x10xf32> to vector<16x5xf32>
    %27 = vector.broadcast %4 : vector<1x5xf32> to vector<16x5xf32>
    %28 = arith.addf %26, %27 : vector<16x5xf32>
    %cst_3 = arith.constant dense<0.000000e+00> : vector<16x10xf32>
    %29 = tpu.matmul %28, %25, %cst_3 {dimension_numbers = #tpu.dot_dimension_numbers<[1], [1], [0], [0], [0, 0, 1, 0], [], []>} : vector<16x5xf32>, vector<10x5xf32>, vector<16x10xf32> -> vector<16x10xf32>
    %30 = tpu.concatenate %29, %29, %29 in 1 : vector<16x10xf32>, vector<16x10xf32>, vector<16x10xf32> -> vector<16x30xf32>
    %c0_4 = arith.constant 0 : index
    %c0_5 = arith.constant 0 : index
    %31 = vector.load %arg0[%c0_4, %c0_5] : memref<16x30xf32, #tpu.memory_space<vmem>>, vector<16x30xf32>
    %c0_6 = arith.constant 0 : index
    %c0_7 = arith.constant 0 : index
    %32 = vector.load %arg1[%c0_6, %c0_7] : memref<16x30xf32, #tpu.memory_space<vmem>>, vector<16x30xf32>
    %cst_8 = arith.constant 0.000000e+00 : f32
    %33 = vector.broadcast %cst_8 : f32 to vector<16x30xf32>
    %34 = arith.cmpf oeq, %32, %33 : vector<16x30xf32>
    %cst_9 = arith.constant -1.000000e+09 : f32
    %35 = vector.broadcast %cst_9 : f32 to vector<16x30xf32>
    %36 = arith.select %34, %35, %30 : vector<16x30xi1>, vector<16x30xf32>
    %37 = vector.extract_strided_slice %36 {offsets = [0, 0], sizes = [8, 30], strides = [1, 1]} : vector<16x30xf32> to vector<8x30xf32>
    %38 = vector.extract_strided_slice %31 {offsets = [0, 0], sizes = [8, 30], strides = [1, 1]} : vector<16x30xf32> to vector<8x30xf32>
    %39 = vector.extract_strided_slice %32 {offsets = [0, 0], sizes = [8, 30], strides = [1, 1]} : vector<16x30xf32> to vector<8x30xf32>
    %cst_10 = arith.constant dense<0xFF800000> : vector<30xf32>
    %40 = vector.multi_reduction <maximumf>, %37, %cst_10 [0] : vector<8x30xf32> to vector<30xf32>
    %41 = vector.shape_cast %40 : vector<30xf32> to vector<1x30xf32>
    %42 = vector.broadcast %41 : vector<1x30xf32> to vector<8x30xf32>
    %43 = arith.subf %37, %42 : vector<8x30xf32>
    %44 = math.exp %43 : vector<8x30xf32>
    %cst_11 = arith.constant dense<0.000000e+00> : vector<30xf32>
    %45 = vector.multi_reduction <add>, %44, %cst_11 [0] : vector<8x30xf32> to vector<30xf32>
    %46 = vector.shape_cast %45 : vector<30xf32> to vector<1x30xf32>
    %47 = tpu.reciprocal %46 {approx = true} : vector<1x30xf32> -> vector<1x30xf32>
    %48 = arith.mulf %44, %38 : vector<8x30xf32>
    %cst_12 = arith.constant dense<0.000000e+00> : vector<30xf32>
    %49 = vector.multi_reduction <add>, %48, %cst_12 [0] : vector<8x30xf32> to vector<30xf32>
    %50 = vector.shape_cast %49 : vector<30xf32> to vector<1x30xf32>
    %51 = arith.mulf %50, %47 : vector<1x30xf32>
    %52 = arith.mulf %44, %39 : vector<8x30xf32>
    %cst_13 = arith.constant dense<0.000000e+00> : vector<30xf32>
    %53 = vector.multi_reduction <add>, %52, %cst_13 [0] : vector<8x30xf32> to vector<30xf32>
    %54 = vector.shape_cast %53 : vector<30xf32> to vector<1x30xf32>
    %55 = arith.mulf %54, %47 : vector<1x30xf32>
    %56 = vector.extract_strided_slice %36 {offsets = [8, 0], sizes = [8, 30], strides = [1, 1]} : vector<16x30xf32> to vector<8x30xf32>
    %57 = vector.extract_strided_slice %31 {offsets = [8, 0], sizes = [8, 30], strides = [1, 1]} : vector<16x30xf32> to vector<8x30xf32>
    %58 = vector.extract_strided_slice %32 {offsets = [8, 0], sizes = [8, 30], strides = [1, 1]} : vector<16x30xf32> to vector<8x30xf32>
    %cst_14 = arith.constant dense<0xFF800000> : vector<30xf32>
    %59 = vector.multi_reduction <maximumf>, %56, %cst_14 [0] : vector<8x30xf32> to vector<30xf32>
    %60 = vector.shape_cast %59 : vector<30xf32> to vector<1x30xf32>
    %61 = vector.broadcast %60 : vector<1x30xf32> to vector<8x30xf32>
    %62 = arith.subf %56, %61 : vector<8x30xf32>
    %63 = math.exp %62 : vector<8x30xf32>
    %cst_15 = arith.constant dense<0.000000e+00> : vector<30xf32>
    %64 = vector.multi_reduction <add>, %63, %cst_15 [0] : vector<8x30xf32> to vector<30xf32>
    %65 = vector.shape_cast %64 : vector<30xf32> to vector<1x30xf32>
    %66 = tpu.reciprocal %65 {approx = true} : vector<1x30xf32> -> vector<1x30xf32>
    %67 = arith.mulf %63, %57 : vector<8x30xf32>
    %cst_16 = arith.constant dense<0.000000e+00> : vector<30xf32>
    %68 = vector.multi_reduction <add>, %67, %cst_16 [0] : vector<8x30xf32> to vector<30xf32>
    %69 = vector.shape_cast %68 : vector<30xf32> to vector<1x30xf32>
    %70 = arith.mulf %69, %66 : vector<1x30xf32>
    %71 = arith.mulf %63, %58 : vector<8x30xf32>
    %cst_17 = arith.constant dense<0.000000e+00> : vector<30xf32>
    %72 = vector.multi_reduction <add>, %71, %cst_17 [0] : vector<8x30xf32> to vector<30xf32>
    %73 = vector.shape_cast %72 : vector<30xf32> to vector<1x30xf32>
    %74 = arith.mulf %73, %66 : vector<1x30xf32>
    %75 = tpu.concatenate %51, %70 in 0 : vector<1x30xf32>, vector<1x30xf32> -> vector<2x30xf32>
    %76 = tpu.concatenate %55, %74 in 0 : vector<1x30xf32>, vector<1x30xf32> -> vector<2x30xf32>
    %77 = vector.extract_strided_slice %8 {offsets = [0, 0], sizes = [1, 5], strides = [1, 1]} : vector<6x5xf32> to vector<1x5xf32>
    %78 = vector.shape_cast %77 : vector<1x5xf32> to vector<1x5xf32>
    %79 = vector.broadcast %78 : vector<1x5xf32> to vector<2x5xf32>
    %80 = vector.extract_strided_slice %8 {offsets = [1, 0], sizes = [1, 5], strides = [1, 1]} : vector<6x5xf32> to vector<1x5xf32>
    %81 = vector.shape_cast %80 : vector<1x5xf32> to vector<1x5xf32>
    %82 = vector.broadcast %81 : vector<1x5xf32> to vector<2x5xf32>
    %83 = vector.extract_strided_slice %8 {offsets = [2, 0], sizes = [1, 5], strides = [1, 1]} : vector<6x5xf32> to vector<1x5xf32>
    %84 = vector.shape_cast %83 : vector<1x5xf32> to vector<1x5xf32>
    %85 = vector.broadcast %84 : vector<1x5xf32> to vector<2x5xf32>
    %86 = vector.extract_strided_slice %8 {offsets = [3, 0], sizes = [1, 5], strides = [1, 1]} : vector<6x5xf32> to vector<1x5xf32>
    %87 = vector.shape_cast %86 : vector<1x5xf32> to vector<1x5xf32>
    %88 = vector.broadcast %87 : vector<1x5xf32> to vector<2x5xf32>
    %89 = vector.extract_strided_slice %8 {offsets = [4, 0], sizes = [1, 5], strides = [1, 1]} : vector<6x5xf32> to vector<1x5xf32>
    %90 = vector.shape_cast %89 : vector<1x5xf32> to vector<1x5xf32>
    %91 = vector.broadcast %90 : vector<1x5xf32> to vector<2x5xf32>
    %92 = vector.extract_strided_slice %8 {offsets = [5, 0], sizes = [1, 5], strides = [1, 1]} : vector<6x5xf32> to vector<1x5xf32>
    %93 = vector.shape_cast %92 : vector<1x5xf32> to vector<1x5xf32>
    %94 = vector.broadcast %93 : vector<1x5xf32> to vector<2x5xf32>
    %95 = vector.extract_strided_slice %9 {offsets = [0, 0], sizes = [1, 5], strides = [1, 1]} : vector<5x5xf32> to vector<1x5xf32>
    %96 = vector.shape_cast %95 : vector<1x5xf32> to vector<1x5xf32>
    %97 = vector.broadcast %96 : vector<1x5xf32> to vector<2x5xf32>
    %98 = vector.extract_strided_slice %9 {offsets = [1, 0], sizes = [1, 5], strides = [1, 1]} : vector<5x5xf32> to vector<1x5xf32>
    %99 = vector.shape_cast %98 : vector<1x5xf32> to vector<1x5xf32>
    %100 = vector.broadcast %99 : vector<1x5xf32> to vector<2x5xf32>
    %101 = vector.extract_strided_slice %9 {offsets = [2, 0], sizes = [1, 5], strides = [1, 1]} : vector<5x5xf32> to vector<1x5xf32>
    %102 = vector.shape_cast %101 : vector<1x5xf32> to vector<1x5xf32>
    %103 = vector.broadcast %102 : vector<1x5xf32> to vector<2x5xf32>
    %104 = vector.extract_strided_slice %9 {offsets = [3, 0], sizes = [1, 5], strides = [1, 1]} : vector<5x5xf32> to vector<1x5xf32>
    %105 = vector.shape_cast %104 : vector<1x5xf32> to vector<1x5xf32>
    %106 = vector.broadcast %105 : vector<1x5xf32> to vector<2x5xf32>
    %107 = vector.extract_strided_slice %9 {offsets = [4, 0], sizes = [1, 5], strides = [1, 1]} : vector<5x5xf32> to vector<1x5xf32>
    %108 = vector.shape_cast %107 : vector<1x5xf32> to vector<1x5xf32>
    %109 = vector.broadcast %108 : vector<1x5xf32> to vector<2x5xf32>
    %110 = vector.shape_cast %5 : vector<1x5xf32> to vector<1x5xf32>
    %111 = vector.broadcast %110 : vector<1x5xf32> to vector<2x5xf32>
    %cst_18 = arith.constant 0.000000e+00 : f32
    %112 = vector.broadcast %cst_18 : f32 to vector<2x5xf32>
    %113 = vector.extract_strided_slice %75 {offsets = [0, 0], sizes = [2, 1], strides = [1, 1]} : vector<2x30xf32> to vector<2x1xf32>
    %114 = vector.broadcast %113 : vector<2x1xf32> to vector<2x5xf32>
    %115 = arith.mulf %114, %79 : vector<2x5xf32>
    %116 = arith.addf %111, %115 : vector<2x5xf32>
    %117 = vector.extract_strided_slice %76 {offsets = [0, 0], sizes = [2, 1], strides = [1, 1]} : vector<2x30xf32> to vector<2x1xf32>
    %118 = vector.broadcast %117 : vector<2x1xf32> to vector<2x5xf32>
    %119 = arith.mulf %118, %88 : vector<2x5xf32>
    %120 = arith.addf %116, %119 : vector<2x5xf32>
    %121 = vector.extract_strided_slice %75 {offsets = [0, 10], sizes = [2, 1], strides = [1, 1]} : vector<2x30xf32> to vector<2x1xf32>
    %122 = vector.broadcast %121 : vector<2x1xf32> to vector<2x5xf32>
    %123 = arith.mulf %122, %82 : vector<2x5xf32>
    %124 = arith.addf %120, %123 : vector<2x5xf32>
    %125 = vector.extract_strided_slice %76 {offsets = [0, 10], sizes = [2, 1], strides = [1, 1]} : vector<2x30xf32> to vector<2x1xf32>
    %126 = vector.broadcast %125 : vector<2x1xf32> to vector<2x5xf32>
    %127 = arith.mulf %126, %91 : vector<2x5xf32>
    %128 = arith.addf %124, %127 : vector<2x5xf32>
    %129 = vector.extract_strided_slice %75 {offsets = [0, 20], sizes = [2, 1], strides = [1, 1]} : vector<2x30xf32> to vector<2x1xf32>
    %130 = vector.broadcast %129 : vector<2x1xf32> to vector<2x5xf32>
    %131 = arith.mulf %130, %85 : vector<2x5xf32>
    %132 = arith.addf %128, %131 : vector<2x5xf32>
    %133 = vector.extract_strided_slice %76 {offsets = [0, 20], sizes = [2, 1], strides = [1, 1]} : vector<2x30xf32> to vector<2x1xf32>
    %134 = vector.broadcast %133 : vector<2x1xf32> to vector<2x5xf32>
    %135 = arith.mulf %134, %94 : vector<2x5xf32>
    %136 = arith.addf %132, %135 : vector<2x5xf32>
    %137 = vector.extract_strided_slice %112 {offsets = [0, 0], sizes = [2, 1], strides = [1, 1]} : vector<2x5xf32> to vector<2x1xf32>
    %138 = vector.broadcast %137 : vector<2x1xf32> to vector<2x5xf32>
    %139 = arith.mulf %138, %97 : vector<2x5xf32>
    %140 = arith.addf %136, %139 : vector<2x5xf32>
    %141 = vector.extract_strided_slice %112 {offsets = [0, 1], sizes = [2, 1], strides = [1, 1]} : vector<2x5xf32> to vector<2x1xf32>
    %142 = vector.broadcast %141 : vector<2x1xf32> to vector<2x5xf32>
    %143 = arith.mulf %142, %100 : vector<2x5xf32>
    %144 = arith.addf %140, %143 : vector<2x5xf32>
    %145 = vector.extract_strided_slice %112 {offsets = [0, 2], sizes = [2, 1], strides = [1, 1]} : vector<2x5xf32> to vector<2x1xf32>
    %146 = vector.broadcast %145 : vector<2x1xf32> to vector<2x5xf32>
    %147 = arith.mulf %146, %103 : vector<2x5xf32>
    %148 = arith.addf %144, %147 : vector<2x5xf32>
    %149 = vector.extract_strided_slice %112 {offsets = [0, 3], sizes = [2, 1], strides = [1, 1]} : vector<2x5xf32> to vector<2x1xf32>
    %150 = vector.broadcast %149 : vector<2x1xf32> to vector<2x5xf32>
    %151 = arith.mulf %150, %106 : vector<2x5xf32>
    %152 = arith.addf %148, %151 : vector<2x5xf32>
    %153 = vector.extract_strided_slice %112 {offsets = [0, 4], sizes = [2, 1], strides = [1, 1]} : vector<2x5xf32> to vector<2x1xf32>
    %154 = vector.broadcast %153 : vector<2x1xf32> to vector<2x5xf32>
    %155 = arith.mulf %154, %109 : vector<2x5xf32>
    %156 = arith.addf %152, %155 : vector<2x5xf32>
    %157 = math.tanh %156 : vector<2x5xf32>
    %158 = vector.extract_strided_slice %75 {offsets = [0, 1], sizes = [2, 1], strides = [1, 1]} : vector<2x30xf32> to vector<2x1xf32>
    %159 = vector.broadcast %158 : vector<2x1xf32> to vector<2x5xf32>
    %160 = arith.mulf %159, %79 : vector<2x5xf32>
    %161 = arith.addf %111, %160 : vector<2x5xf32>
    %162 = vector.extract_strided_slice %76 {offsets = [0, 1], sizes = [2, 1], strides = [1, 1]} : vector<2x30xf32> to vector<2x1xf32>
    %163 = vector.broadcast %162 : vector<2x1xf32> to vector<2x5xf32>
    %164 = arith.mulf %163, %88 : vector<2x5xf32>
    %165 = arith.addf %161, %164 : vector<2x5xf32>
    %166 = vector.extract_strided_slice %75 {offsets = [0, 11], sizes = [2, 1], strides = [1, 1]} : vector<2x30xf32> to vector<2x1xf32>
    %167 = vector.broadcast %166 : vector<2x1xf32> to vector<2x5xf32>
    %168 = arith.mulf %167, %82 : vector<2x5xf32>
    %169 = arith.addf %165, %168 : vector<2x5xf32>
    %170 = vector.extract_strided_slice %76 {offsets = [0, 11], sizes = [2, 1], strides = [1, 1]} : vector<2x30xf32> to vector<2x1xf32>
    %171 = vector.broadcast %170 : vector<2x1xf32> to vector<2x5xf32>
    %172 = arith.mulf %171, %91 : vector<2x5xf32>
    %173 = arith.addf %169, %172 : vector<2x5xf32>
    %174 = vector.extract_strided_slice %75 {offsets = [0, 21], sizes = [2, 1], strides = [1, 1]} : vector<2x30xf32> to vector<2x1xf32>
    %175 = vector.broadcast %174 : vector<2x1xf32> to vector<2x5xf32>
    %176 = arith.mulf %175, %85 : vector<2x5xf32>
    %177 = arith.addf %173, %176 : vector<2x5xf32>
    %178 = vector.extract_strided_slice %76 {offsets = [0, 21], sizes = [2, 1], strides = [1, 1]} : vector<2x30xf32> to vector<2x1xf32>
    %179 = vector.broadcast %178 : vector<2x1xf32> to vector<2x5xf32>
    %180 = arith.mulf %179, %94 : vector<2x5xf32>
    %181 = arith.addf %177, %180 : vector<2x5xf32>
    %182 = vector.extract_strided_slice %157 {offsets = [0, 0], sizes = [2, 1], strides = [1, 1]} : vector<2x5xf32> to vector<2x1xf32>
    %183 = vector.broadcast %182 : vector<2x1xf32> to vector<2x5xf32>
    %184 = arith.mulf %183, %97 : vector<2x5xf32>
    %185 = arith.addf %181, %184 : vector<2x5xf32>
    %186 = vector.extract_strided_slice %157 {offsets = [0, 1], sizes = [2, 1], strides = [1, 1]} : vector<2x5xf32> to vector<2x1xf32>
    %187 = vector.broadcast %186 : vector<2x1xf32> to vector<2x5xf32>
    %188 = arith.mulf %187, %100 : vector<2x5xf32>
    %189 = arith.addf %185, %188 : vector<2x5xf32>
    %190 = vector.extract_strided_slice %157 {offsets = [0, 2], sizes = [2, 1], strides = [1, 1]} : vector<2x5xf32> to vector<2x1xf32>
    %191 = vector.broadcast %190 : vector<2x1xf32> to vector<2x5xf32>
    %192 = arith.mulf %191, %103 : vector<2x5xf32>
    %193 = arith.addf %189, %192 : vector<2x5xf32>
    %194 = vector.extract_strided_slice %157 {offsets = [0, 3], sizes = [2, 1], strides = [1, 1]} : vector<2x5xf32> to vector<2x1xf32>
    %195 = vector.broadcast %194 : vector<2x1xf32> to vector<2x5xf32>
    %196 = arith.mulf %195, %106 : vector<2x5xf32>
    %197 = arith.addf %193, %196 : vector<2x5xf32>
    %198 = vector.extract_strided_slice %157 {offsets = [0, 4], sizes = [2, 1], strides = [1, 1]} : vector<2x5xf32> to vector<2x1xf32>
    %199 = vector.broadcast %198 : vector<2x1xf32> to vector<2x5xf32>
    %200 = arith.mulf %199, %109 : vector<2x5xf32>
    %201 = arith.addf %197, %200 : vector<2x5xf32>
    %202 = math.tanh %201 : vector<2x5xf32>
    %203 = vector.extract_strided_slice %75 {offsets = [0, 2], sizes = [2, 1], strides = [1, 1]} : vector<2x30xf32> to vector<2x1xf32>
    %204 = vector.broadcast %203 : vector<2x1xf32> to vector<2x5xf32>
    %205 = arith.mulf %204, %79 : vector<2x5xf32>
    %206 = arith.addf %111, %205 : vector<2x5xf32>
    %207 = vector.extract_strided_slice %76 {offsets = [0, 2], sizes = [2, 1], strides = [1, 1]} : vector<2x30xf32> to vector<2x1xf32>
    %208 = vector.broadcast %207 : vector<2x1xf32> to vector<2x5xf32>
    %209 = arith.mulf %208, %88 : vector<2x5xf32>
    %210 = arith.addf %206, %209 : vector<2x5xf32>
    %211 = vector.extract_strided_slice %75 {offsets = [0, 12], sizes = [2, 1], strides = [1, 1]} : vector<2x30xf32> to vector<2x1xf32>
    %212 = vector.broadcast %211 : vector<2x1xf32> to vector<2x5xf32>
    %213 = arith.mulf %212, %82 : vector<2x5xf32>
    %214 = arith.addf %210, %213 : vector<2x5xf32>
    %215 = vector.extract_strided_slice %76 {offsets = [0, 12], sizes = [2, 1], strides = [1, 1]} : vector<2x30xf32> to vector<2x1xf32>
    %216 = vector.broadcast %215 : vector<2x1xf32> to vector<2x5xf32>
    %217 = arith.mulf %216, %91 : vector<2x5xf32>
    %218 = arith.addf %214, %217 : vector<2x5xf32>
    %219 = vector.extract_strided_slice %75 {offsets = [0, 22], sizes = [2, 1], strides = [1, 1]} : vector<2x30xf32> to vector<2x1xf32>
    %220 = vector.broadcast %219 : vector<2x1xf32> to vector<2x5xf32>
    %221 = arith.mulf %220, %85 : vector<2x5xf32>
    %222 = arith.addf %218, %221 : vector<2x5xf32>
    %223 = vector.extract_strided_slice %76 {offsets = [0, 22], sizes = [2, 1], strides = [1, 1]} : vector<2x30xf32> to vector<2x1xf32>
    %224 = vector.broadcast %223 : vector<2x1xf32> to vector<2x5xf32>
    %225 = arith.mulf %224, %94 : vector<2x5xf32>
    %226 = arith.addf %222, %225 : vector<2x5xf32>
    %227 = vector.extract_strided_slice %202 {offsets = [0, 0], sizes = [2, 1], strides = [1, 1]} : vector<2x5xf32> to vector<2x1xf32>
    %228 = vector.broadcast %227 : vector<2x1xf32> to vector<2x5xf32>
    %229 = arith.mulf %228, %97 : vector<2x5xf32>
    %230 = arith.addf %226, %229 : vector<2x5xf32>
    %231 = vector.extract_strided_slice %202 {offsets = [0, 1], sizes = [2, 1], strides = [1, 1]} : vector<2x5xf32> to vector<2x1xf32>
    %232 = vector.broadcast %231 : vector<2x1xf32> to vector<2x5xf32>
    %233 = arith.mulf %232, %100 : vector<2x5xf32>
    %234 = arith.addf %230, %233 : vector<2x5xf32>
    %235 = vector.extract_strided_slice %202 {offsets = [0, 2], sizes = [2, 1], strides = [1, 1]} : vector<2x5xf32> to vector<2x1xf32>
    %236 = vector.broadcast %235 : vector<2x1xf32> to vector<2x5xf32>
    %237 = arith.mulf %236, %103 : vector<2x5xf32>
    %238 = arith.addf %234, %237 : vector<2x5xf32>
    %239 = vector.extract_strided_slice %202 {offsets = [0, 3], sizes = [2, 1], strides = [1, 1]} : vector<2x5xf32> to vector<2x1xf32>
    %240 = vector.broadcast %239 : vector<2x1xf32> to vector<2x5xf32>
    %241 = arith.mulf %240, %106 : vector<2x5xf32>
    %242 = arith.addf %238, %241 : vector<2x5xf32>
    %243 = vector.extract_strided_slice %202 {offsets = [0, 4], sizes = [2, 1], strides = [1, 1]} : vector<2x5xf32> to vector<2x1xf32>
    %244 = vector.broadcast %243 : vector<2x1xf32> to vector<2x5xf32>
    %245 = arith.mulf %244, %109 : vector<2x5xf32>
    %246 = arith.addf %242, %245 : vector<2x5xf32>
    %247 = math.tanh %246 : vector<2x5xf32>
    %248 = vector.extract_strided_slice %75 {offsets = [0, 3], sizes = [2, 1], strides = [1, 1]} : vector<2x30xf32> to vector<2x1xf32>
    %249 = vector.broadcast %248 : vector<2x1xf32> to vector<2x5xf32>
    %250 = arith.mulf %249, %79 : vector<2x5xf32>
    %251 = arith.addf %111, %250 : vector<2x5xf32>
    %252 = vector.extract_strided_slice %76 {offsets = [0, 3], sizes = [2, 1], strides = [1, 1]} : vector<2x30xf32> to vector<2x1xf32>
    %253 = vector.broadcast %252 : vector<2x1xf32> to vector<2x5xf32>
    %254 = arith.mulf %253, %88 : vector<2x5xf32>
    %255 = arith.addf %251, %254 : vector<2x5xf32>
    %256 = vector.extract_strided_slice %75 {offsets = [0, 13], sizes = [2, 1], strides = [1, 1]} : vector<2x30xf32> to vector<2x1xf32>
    %257 = vector.broadcast %256 : vector<2x1xf32> to vector<2x5xf32>
    %258 = arith.mulf %257, %82 : vector<2x5xf32>
    %259 = arith.addf %255, %258 : vector<2x5xf32>
    %260 = vector.extract_strided_slice %76 {offsets = [0, 13], sizes = [2, 1], strides = [1, 1]} : vector<2x30xf32> to vector<2x1xf32>
    %261 = vector.broadcast %260 : vector<2x1xf32> to vector<2x5xf32>
    %262 = arith.mulf %261, %91 : vector<2x5xf32>
    %263 = arith.addf %259, %262 : vector<2x5xf32>
    %264 = vector.extract_strided_slice %75 {offsets = [0, 23], sizes = [2, 1], strides = [1, 1]} : vector<2x30xf32> to vector<2x1xf32>
    %265 = vector.broadcast %264 : vector<2x1xf32> to vector<2x5xf32>
    %266 = arith.mulf %265, %85 : vector<2x5xf32>
    %267 = arith.addf %263, %266 : vector<2x5xf32>
    %268 = vector.extract_strided_slice %76 {offsets = [0, 23], sizes = [2, 1], strides = [1, 1]} : vector<2x30xf32> to vector<2x1xf32>
    %269 = vector.broadcast %268 : vector<2x1xf32> to vector<2x5xf32>
    %270 = arith.mulf %269, %94 : vector<2x5xf32>
    %271 = arith.addf %267, %270 : vector<2x5xf32>
    %272 = vector.extract_strided_slice %247 {offsets = [0, 0], sizes = [2, 1], strides = [1, 1]} : vector<2x5xf32> to vector<2x1xf32>
    %273 = vector.broadcast %272 : vector<2x1xf32> to vector<2x5xf32>
    %274 = arith.mulf %273, %97 : vector<2x5xf32>
    %275 = arith.addf %271, %274 : vector<2x5xf32>
    %276 = vector.extract_strided_slice %247 {offsets = [0, 1], sizes = [2, 1], strides = [1, 1]} : vector<2x5xf32> to vector<2x1xf32>
    %277 = vector.broadcast %276 : vector<2x1xf32> to vector<2x5xf32>
    %278 = arith.mulf %277, %100 : vector<2x5xf32>
    %279 = arith.addf %275, %278 : vector<2x5xf32>
    %280 = vector.extract_strided_slice %247 {offsets = [0, 2], sizes = [2, 1], strides = [1, 1]} : vector<2x5xf32> to vector<2x1xf32>
    %281 = vector.broadcast %280 : vector<2x1xf32> to vector<2x5xf32>
    %282 = arith.mulf %281, %103 : vector<2x5xf32>
    %283 = arith.addf %279, %282 : vector<2x5xf32>
    %284 = vector.extract_strided_slice %247 {offsets = [0, 3], sizes = [2, 1], strides = [1, 1]} : vector<2x5xf32> to vector<2x1xf32>
    %285 = vector.broadcast %284 : vector<2x1xf32> to vector<2x5xf32>
    %286 = arith.mulf %285, %106 : vector<2x5xf32>
    %287 = arith.addf %283, %286 : vector<2x5xf32>
    %288 = vector.extract_strided_slice %247 {offsets = [0, 4], sizes = [2, 1], strides = [1, 1]} : vector<2x5xf32> to vector<2x1xf32>
    %289 = vector.broadcast %288 : vector<2x1xf32> to vector<2x5xf32>
    %290 = arith.mulf %289, %109 : vector<2x5xf32>
    %291 = arith.addf %287, %290 : vector<2x5xf32>
    %292 = math.tanh %291 : vector<2x5xf32>
    %293 = vector.extract_strided_slice %75 {offsets = [0, 4], sizes = [2, 1], strides = [1, 1]} : vector<2x30xf32> to vector<2x1xf32>
    %294 = vector.broadcast %293 : vector<2x1xf32> to vector<2x5xf32>
    %295 = arith.mulf %294, %79 : vector<2x5xf32>
    %296 = arith.addf %111, %295 : vector<2x5xf32>
    %297 = vector.extract_strided_slice %76 {offsets = [0, 4], sizes = [2, 1], strides = [1, 1]} : vector<2x30xf32> to vector<2x1xf32>
    %298 = vector.broadcast %297 : vector<2x1xf32> to vector<2x5xf32>
    %299 = arith.mulf %298, %88 : vector<2x5xf32>
    %300 = arith.addf %296, %299 : vector<2x5xf32>
    %301 = vector.extract_strided_slice %75 {offsets = [0, 14], sizes = [2, 1], strides = [1, 1]} : vector<2x30xf32> to vector<2x1xf32>
    %302 = vector.broadcast %301 : vector<2x1xf32> to vector<2x5xf32>
    %303 = arith.mulf %302, %82 : vector<2x5xf32>
    %304 = arith.addf %300, %303 : vector<2x5xf32>
    %305 = vector.extract_strided_slice %76 {offsets = [0, 14], sizes = [2, 1], strides = [1, 1]} : vector<2x30xf32> to vector<2x1xf32>
    %306 = vector.broadcast %305 : vector<2x1xf32> to vector<2x5xf32>
    %307 = arith.mulf %306, %91 : vector<2x5xf32>
    %308 = arith.addf %304, %307 : vector<2x5xf32>
    %309 = vector.extract_strided_slice %75 {offsets = [0, 24], sizes = [2, 1], strides = [1, 1]} : vector<2x30xf32> to vector<2x1xf32>
    %310 = vector.broadcast %309 : vector<2x1xf32> to vector<2x5xf32>
    %311 = arith.mulf %310, %85 : vector<2x5xf32>
    %312 = arith.addf %308, %311 : vector<2x5xf32>
    %313 = vector.extract_strided_slice %76 {offsets = [0, 24], sizes = [2, 1], strides = [1, 1]} : vector<2x30xf32> to vector<2x1xf32>
    %314 = vector.broadcast %313 : vector<2x1xf32> to vector<2x5xf32>
    %315 = arith.mulf %314, %94 : vector<2x5xf32>
    %316 = arith.addf %312, %315 : vector<2x5xf32>
    %317 = vector.extract_strided_slice %292 {offsets = [0, 0], sizes = [2, 1], strides = [1, 1]} : vector<2x5xf32> to vector<2x1xf32>
    %318 = vector.broadcast %317 : vector<2x1xf32> to vector<2x5xf32>
    %319 = arith.mulf %318, %97 : vector<2x5xf32>
    %320 = arith.addf %316, %319 : vector<2x5xf32>
    %321 = vector.extract_strided_slice %292 {offsets = [0, 1], sizes = [2, 1], strides = [1, 1]} : vector<2x5xf32> to vector<2x1xf32>
    %322 = vector.broadcast %321 : vector<2x1xf32> to vector<2x5xf32>
    %323 = arith.mulf %322, %100 : vector<2x5xf32>
    %324 = arith.addf %320, %323 : vector<2x5xf32>
    %325 = vector.extract_strided_slice %292 {offsets = [0, 2], sizes = [2, 1], strides = [1, 1]} : vector<2x5xf32> to vector<2x1xf32>
    %326 = vector.broadcast %325 : vector<2x1xf32> to vector<2x5xf32>
    %327 = arith.mulf %326, %103 : vector<2x5xf32>
    %328 = arith.addf %324, %327 : vector<2x5xf32>
    %329 = vector.extract_strided_slice %292 {offsets = [0, 3], sizes = [2, 1], strides = [1, 1]} : vector<2x5xf32> to vector<2x1xf32>
    %330 = vector.broadcast %329 : vector<2x1xf32> to vector<2x5xf32>
    %331 = arith.mulf %330, %106 : vector<2x5xf32>
    %332 = arith.addf %328, %331 : vector<2x5xf32>
    %333 = vector.extract_strided_slice %292 {offsets = [0, 4], sizes = [2, 1], strides = [1, 1]} : vector<2x5xf32> to vector<2x1xf32>
    %334 = vector.broadcast %333 : vector<2x1xf32> to vector<2x5xf32>
    %335 = arith.mulf %334, %109 : vector<2x5xf32>
    %336 = arith.addf %332, %335 : vector<2x5xf32>
    %337 = math.tanh %336 : vector<2x5xf32>
    %338 = vector.extract_strided_slice %75 {offsets = [0, 5], sizes = [2, 1], strides = [1, 1]} : vector<2x30xf32> to vector<2x1xf32>
    %339 = vector.broadcast %338 : vector<2x1xf32> to vector<2x5xf32>
    %340 = arith.mulf %339, %79 : vector<2x5xf32>
    %341 = arith.addf %111, %340 : vector<2x5xf32>
    %342 = vector.extract_strided_slice %76 {offsets = [0, 5], sizes = [2, 1], strides = [1, 1]} : vector<2x30xf32> to vector<2x1xf32>
    %343 = vector.broadcast %342 : vector<2x1xf32> to vector<2x5xf32>
    %344 = arith.mulf %343, %88 : vector<2x5xf32>
    %345 = arith.addf %341, %344 : vector<2x5xf32>
    %346 = vector.extract_strided_slice %75 {offsets = [0, 15], sizes = [2, 1], strides = [1, 1]} : vector<2x30xf32> to vector<2x1xf32>
    %347 = vector.broadcast %346 : vector<2x1xf32> to vector<2x5xf32>
    %348 = arith.mulf %347, %82 : vector<2x5xf32>
    %349 = arith.addf %345, %348 : vector<2x5xf32>
    %350 = vector.extract_strided_slice %76 {offsets = [0, 15], sizes = [2, 1], strides = [1, 1]} : vector<2x30xf32> to vector<2x1xf32>
    %351 = vector.broadcast %350 : vector<2x1xf32> to vector<2x5xf32>
    %352 = arith.mulf %351, %91 : vector<2x5xf32>
    %353 = arith.addf %349, %352 : vector<2x5xf32>
    %354 = vector.extract_strided_slice %75 {offsets = [0, 25], sizes = [2, 1], strides = [1, 1]} : vector<2x30xf32> to vector<2x1xf32>
    %355 = vector.broadcast %354 : vector<2x1xf32> to vector<2x5xf32>
    %356 = arith.mulf %355, %85 : vector<2x5xf32>
    %357 = arith.addf %353, %356 : vector<2x5xf32>
    %358 = vector.extract_strided_slice %76 {offsets = [0, 25], sizes = [2, 1], strides = [1, 1]} : vector<2x30xf32> to vector<2x1xf32>
    %359 = vector.broadcast %358 : vector<2x1xf32> to vector<2x5xf32>
    %360 = arith.mulf %359, %94 : vector<2x5xf32>
    %361 = arith.addf %357, %360 : vector<2x5xf32>
    %362 = vector.extract_strided_slice %337 {offsets = [0, 0], sizes = [2, 1], strides = [1, 1]} : vector<2x5xf32> to vector<2x1xf32>
    %363 = vector.broadcast %362 : vector<2x1xf32> to vector<2x5xf32>
    %364 = arith.mulf %363, %97 : vector<2x5xf32>
    %365 = arith.addf %361, %364 : vector<2x5xf32>
    %366 = vector.extract_strided_slice %337 {offsets = [0, 1], sizes = [2, 1], strides = [1, 1]} : vector<2x5xf32> to vector<2x1xf32>
    %367 = vector.broadcast %366 : vector<2x1xf32> to vector<2x5xf32>
    %368 = arith.mulf %367, %100 : vector<2x5xf32>
    %369 = arith.addf %365, %368 : vector<2x5xf32>
    %370 = vector.extract_strided_slice %337 {offsets = [0, 2], sizes = [2, 1], strides = [1, 1]} : vector<2x5xf32> to vector<2x1xf32>
    %371 = vector.broadcast %370 : vector<2x1xf32> to vector<2x5xf32>
    %372 = arith.mulf %371, %103 : vector<2x5xf32>
    %373 = arith.addf %369, %372 : vector<2x5xf32>
    %374 = vector.extract_strided_slice %337 {offsets = [0, 3], sizes = [2, 1], strides = [1, 1]} : vector<2x5xf32> to vector<2x1xf32>
    %375 = vector.broadcast %374 : vector<2x1xf32> to vector<2x5xf32>
    %376 = arith.mulf %375, %106 : vector<2x5xf32>
    %377 = arith.addf %373, %376 : vector<2x5xf32>
    %378 = vector.extract_strided_slice %337 {offsets = [0, 4], sizes = [2, 1], strides = [1, 1]} : vector<2x5xf32> to vector<2x1xf32>
    %379 = vector.broadcast %378 : vector<2x1xf32> to vector<2x5xf32>
    %380 = arith.mulf %379, %109 : vector<2x5xf32>
    %381 = arith.addf %377, %380 : vector<2x5xf32>
    %382 = math.tanh %381 : vector<2x5xf32>
    %383 = vector.extract_strided_slice %75 {offsets = [0, 6], sizes = [2, 1], strides = [1, 1]} : vector<2x30xf32> to vector<2x1xf32>
    %384 = vector.broadcast %383 : vector<2x1xf32> to vector<2x5xf32>
    %385 = arith.mulf %384, %79 : vector<2x5xf32>
    %386 = arith.addf %111, %385 : vector<2x5xf32>
    %387 = vector.extract_strided_slice %76 {offsets = [0, 6], sizes = [2, 1], strides = [1, 1]} : vector<2x30xf32> to vector<2x1xf32>
    %388 = vector.broadcast %387 : vector<2x1xf32> to vector<2x5xf32>
    %389 = arith.mulf %388, %88 : vector<2x5xf32>
    %390 = arith.addf %386, %389 : vector<2x5xf32>
    %391 = vector.extract_strided_slice %75 {offsets = [0, 16], sizes = [2, 1], strides = [1, 1]} : vector<2x30xf32> to vector<2x1xf32>
    %392 = vector.broadcast %391 : vector<2x1xf32> to vector<2x5xf32>
    %393 = arith.mulf %392, %82 : vector<2x5xf32>
    %394 = arith.addf %390, %393 : vector<2x5xf32>
    %395 = vector.extract_strided_slice %76 {offsets = [0, 16], sizes = [2, 1], strides = [1, 1]} : vector<2x30xf32> to vector<2x1xf32>
    %396 = vector.broadcast %395 : vector<2x1xf32> to vector<2x5xf32>
    %397 = arith.mulf %396, %91 : vector<2x5xf32>
    %398 = arith.addf %394, %397 : vector<2x5xf32>
    %399 = vector.extract_strided_slice %75 {offsets = [0, 26], sizes = [2, 1], strides = [1, 1]} : vector<2x30xf32> to vector<2x1xf32>
    %400 = vector.broadcast %399 : vector<2x1xf32> to vector<2x5xf32>
    %401 = arith.mulf %400, %85 : vector<2x5xf32>
    %402 = arith.addf %398, %401 : vector<2x5xf32>
    %403 = vector.extract_strided_slice %76 {offsets = [0, 26], sizes = [2, 1], strides = [1, 1]} : vector<2x30xf32> to vector<2x1xf32>
    %404 = vector.broadcast %403 : vector<2x1xf32> to vector<2x5xf32>
    %405 = arith.mulf %404, %94 : vector<2x5xf32>
    %406 = arith.addf %402, %405 : vector<2x5xf32>
    %407 = vector.extract_strided_slice %382 {offsets = [0, 0], sizes = [2, 1], strides = [1, 1]} : vector<2x5xf32> to vector<2x1xf32>
    %408 = vector.broadcast %407 : vector<2x1xf32> to vector<2x5xf32>
    %409 = arith.mulf %408, %97 : vector<2x5xf32>
    %410 = arith.addf %406, %409 : vector<2x5xf32>
    %411 = vector.extract_strided_slice %382 {offsets = [0, 1], sizes = [2, 1], strides = [1, 1]} : vector<2x5xf32> to vector<2x1xf32>
    %412 = vector.broadcast %411 : vector<2x1xf32> to vector<2x5xf32>
    %413 = arith.mulf %412, %100 : vector<2x5xf32>
    %414 = arith.addf %410, %413 : vector<2x5xf32>
    %415 = vector.extract_strided_slice %382 {offsets = [0, 2], sizes = [2, 1], strides = [1, 1]} : vector<2x5xf32> to vector<2x1xf32>
    %416 = vector.broadcast %415 : vector<2x1xf32> to vector<2x5xf32>
    %417 = arith.mulf %416, %103 : vector<2x5xf32>
    %418 = arith.addf %414, %417 : vector<2x5xf32>
    %419 = vector.extract_strided_slice %382 {offsets = [0, 3], sizes = [2, 1], strides = [1, 1]} : vector<2x5xf32> to vector<2x1xf32>
    %420 = vector.broadcast %419 : vector<2x1xf32> to vector<2x5xf32>
    %421 = arith.mulf %420, %106 : vector<2x5xf32>
    %422 = arith.addf %418, %421 : vector<2x5xf32>
    %423 = vector.extract_strided_slice %382 {offsets = [0, 4], sizes = [2, 1], strides = [1, 1]} : vector<2x5xf32> to vector<2x1xf32>
    %424 = vector.broadcast %423 : vector<2x1xf32> to vector<2x5xf32>
    %425 = arith.mulf %424, %109 : vector<2x5xf32>
    %426 = arith.addf %422, %425 : vector<2x5xf32>
    %427 = math.tanh %426 : vector<2x5xf32>
    %428 = vector.extract_strided_slice %75 {offsets = [0, 7], sizes = [2, 1], strides = [1, 1]} : vector<2x30xf32> to vector<2x1xf32>
    %429 = vector.broadcast %428 : vector<2x1xf32> to vector<2x5xf32>
    %430 = arith.mulf %429, %79 : vector<2x5xf32>
    %431 = arith.addf %111, %430 : vector<2x5xf32>
    %432 = vector.extract_strided_slice %76 {offsets = [0, 7], sizes = [2, 1], strides = [1, 1]} : vector<2x30xf32> to vector<2x1xf32>
    %433 = vector.broadcast %432 : vector<2x1xf32> to vector<2x5xf32>
    %434 = arith.mulf %433, %88 : vector<2x5xf32>
    %435 = arith.addf %431, %434 : vector<2x5xf32>
    %436 = vector.extract_strided_slice %75 {offsets = [0, 17], sizes = [2, 1], strides = [1, 1]} : vector<2x30xf32> to vector<2x1xf32>
    %437 = vector.broadcast %436 : vector<2x1xf32> to vector<2x5xf32>
    %438 = arith.mulf %437, %82 : vector<2x5xf32>
    %439 = arith.addf %435, %438 : vector<2x5xf32>
    %440 = vector.extract_strided_slice %76 {offsets = [0, 17], sizes = [2, 1], strides = [1, 1]} : vector<2x30xf32> to vector<2x1xf32>
    %441 = vector.broadcast %440 : vector<2x1xf32> to vector<2x5xf32>
    %442 = arith.mulf %441, %91 : vector<2x5xf32>
    %443 = arith.addf %439, %442 : vector<2x5xf32>
    %444 = vector.extract_strided_slice %75 {offsets = [0, 27], sizes = [2, 1], strides = [1, 1]} : vector<2x30xf32> to vector<2x1xf32>
    %445 = vector.broadcast %444 : vector<2x1xf32> to vector<2x5xf32>
    %446 = arith.mulf %445, %85 : vector<2x5xf32>
    %447 = arith.addf %443, %446 : vector<2x5xf32>
    %448 = vector.extract_strided_slice %76 {offsets = [0, 27], sizes = [2, 1], strides = [1, 1]} : vector<2x30xf32> to vector<2x1xf32>
    %449 = vector.broadcast %448 : vector<2x1xf32> to vector<2x5xf32>
    %450 = arith.mulf %449, %94 : vector<2x5xf32>
    %451 = arith.addf %447, %450 : vector<2x5xf32>
    %452 = vector.extract_strided_slice %427 {offsets = [0, 0], sizes = [2, 1], strides = [1, 1]} : vector<2x5xf32> to vector<2x1xf32>
    %453 = vector.broadcast %452 : vector<2x1xf32> to vector<2x5xf32>
    %454 = arith.mulf %453, %97 : vector<2x5xf32>
    %455 = arith.addf %451, %454 : vector<2x5xf32>
    %456 = vector.extract_strided_slice %427 {offsets = [0, 1], sizes = [2, 1], strides = [1, 1]} : vector<2x5xf32> to vector<2x1xf32>
    %457 = vector.broadcast %456 : vector<2x1xf32> to vector<2x5xf32>
    %458 = arith.mulf %457, %100 : vector<2x5xf32>
    %459 = arith.addf %455, %458 : vector<2x5xf32>
    %460 = vector.extract_strided_slice %427 {offsets = [0, 2], sizes = [2, 1], strides = [1, 1]} : vector<2x5xf32> to vector<2x1xf32>
    %461 = vector.broadcast %460 : vector<2x1xf32> to vector<2x5xf32>
    %462 = arith.mulf %461, %103 : vector<2x5xf32>
    %463 = arith.addf %459, %462 : vector<2x5xf32>
    %464 = vector.extract_strided_slice %427 {offsets = [0, 3], sizes = [2, 1], strides = [1, 1]} : vector<2x5xf32> to vector<2x1xf32>
    %465 = vector.broadcast %464 : vector<2x1xf32> to vector<2x5xf32>
    %466 = arith.mulf %465, %106 : vector<2x5xf32>
    %467 = arith.addf %463, %466 : vector<2x5xf32>
    %468 = vector.extract_strided_slice %427 {offsets = [0, 4], sizes = [2, 1], strides = [1, 1]} : vector<2x5xf32> to vector<2x1xf32>
    %469 = vector.broadcast %468 : vector<2x1xf32> to vector<2x5xf32>
    %470 = arith.mulf %469, %109 : vector<2x5xf32>
    %471 = arith.addf %467, %470 : vector<2x5xf32>
    %472 = math.tanh %471 : vector<2x5xf32>
    %473 = vector.extract_strided_slice %75 {offsets = [0, 8], sizes = [2, 1], strides = [1, 1]} : vector<2x30xf32> to vector<2x1xf32>
    %474 = vector.broadcast %473 : vector<2x1xf32> to vector<2x5xf32>
    %475 = arith.mulf %474, %79 : vector<2x5xf32>
    %476 = arith.addf %111, %475 : vector<2x5xf32>
    %477 = vector.extract_strided_slice %76 {offsets = [0, 8], sizes = [2, 1], strides = [1, 1]} : vector<2x30xf32> to vector<2x1xf32>
    %478 = vector.broadcast %477 : vector<2x1xf32> to vector<2x5xf32>
    %479 = arith.mulf %478, %88 : vector<2x5xf32>
    %480 = arith.addf %476, %479 : vector<2x5xf32>
    %481 = vector.extract_strided_slice %75 {offsets = [0, 18], sizes = [2, 1], strides = [1, 1]} : vector<2x30xf32> to vector<2x1xf32>
    %482 = vector.broadcast %481 : vector<2x1xf32> to vector<2x5xf32>
    %483 = arith.mulf %482, %82 : vector<2x5xf32>
    %484 = arith.addf %480, %483 : vector<2x5xf32>
    %485 = vector.extract_strided_slice %76 {offsets = [0, 18], sizes = [2, 1], strides = [1, 1]} : vector<2x30xf32> to vector<2x1xf32>
    %486 = vector.broadcast %485 : vector<2x1xf32> to vector<2x5xf32>
    %487 = arith.mulf %486, %91 : vector<2x5xf32>
    %488 = arith.addf %484, %487 : vector<2x5xf32>
    %489 = vector.extract_strided_slice %75 {offsets = [0, 28], sizes = [2, 1], strides = [1, 1]} : vector<2x30xf32> to vector<2x1xf32>
    %490 = vector.broadcast %489 : vector<2x1xf32> to vector<2x5xf32>
    %491 = arith.mulf %490, %85 : vector<2x5xf32>
    %492 = arith.addf %488, %491 : vector<2x5xf32>
    %493 = vector.extract_strided_slice %76 {offsets = [0, 28], sizes = [2, 1], strides = [1, 1]} : vector<2x30xf32> to vector<2x1xf32>
    %494 = vector.broadcast %493 : vector<2x1xf32> to vector<2x5xf32>
    %495 = arith.mulf %494, %94 : vector<2x5xf32>
    %496 = arith.addf %492, %495 : vector<2x5xf32>
    %497 = vector.extract_strided_slice %472 {offsets = [0, 0], sizes = [2, 1], strides = [1, 1]} : vector<2x5xf32> to vector<2x1xf32>
    %498 = vector.broadcast %497 : vector<2x1xf32> to vector<2x5xf32>
    %499 = arith.mulf %498, %97 : vector<2x5xf32>
    %500 = arith.addf %496, %499 : vector<2x5xf32>
    %501 = vector.extract_strided_slice %472 {offsets = [0, 1], sizes = [2, 1], strides = [1, 1]} : vector<2x5xf32> to vector<2x1xf32>
    %502 = vector.broadcast %501 : vector<2x1xf32> to vector<2x5xf32>
    %503 = arith.mulf %502, %100 : vector<2x5xf32>
    %504 = arith.addf %500, %503 : vector<2x5xf32>
    %505 = vector.extract_strided_slice %472 {offsets = [0, 2], sizes = [2, 1], strides = [1, 1]} : vector<2x5xf32> to vector<2x1xf32>
    %506 = vector.broadcast %505 : vector<2x1xf32> to vector<2x5xf32>
    %507 = arith.mulf %506, %103 : vector<2x5xf32>
    %508 = arith.addf %504, %507 : vector<2x5xf32>
    %509 = vector.extract_strided_slice %472 {offsets = [0, 3], sizes = [2, 1], strides = [1, 1]} : vector<2x5xf32> to vector<2x1xf32>
    %510 = vector.broadcast %509 : vector<2x1xf32> to vector<2x5xf32>
    %511 = arith.mulf %510, %106 : vector<2x5xf32>
    %512 = arith.addf %508, %511 : vector<2x5xf32>
    %513 = vector.extract_strided_slice %472 {offsets = [0, 4], sizes = [2, 1], strides = [1, 1]} : vector<2x5xf32> to vector<2x1xf32>
    %514 = vector.broadcast %513 : vector<2x1xf32> to vector<2x5xf32>
    %515 = arith.mulf %514, %109 : vector<2x5xf32>
    %516 = arith.addf %512, %515 : vector<2x5xf32>
    %517 = math.tanh %516 : vector<2x5xf32>
    %518 = vector.extract_strided_slice %75 {offsets = [0, 9], sizes = [2, 1], strides = [1, 1]} : vector<2x30xf32> to vector<2x1xf32>
    %519 = vector.broadcast %518 : vector<2x1xf32> to vector<2x5xf32>
    %520 = arith.mulf %519, %79 : vector<2x5xf32>
    %521 = arith.addf %111, %520 : vector<2x5xf32>
    %522 = vector.extract_strided_slice %76 {offsets = [0, 9], sizes = [2, 1], strides = [1, 1]} : vector<2x30xf32> to vector<2x1xf32>
    %523 = vector.broadcast %522 : vector<2x1xf32> to vector<2x5xf32>
    %524 = arith.mulf %523, %88 : vector<2x5xf32>
    %525 = arith.addf %521, %524 : vector<2x5xf32>
    %526 = vector.extract_strided_slice %75 {offsets = [0, 19], sizes = [2, 1], strides = [1, 1]} : vector<2x30xf32> to vector<2x1xf32>
    %527 = vector.broadcast %526 : vector<2x1xf32> to vector<2x5xf32>
    %528 = arith.mulf %527, %82 : vector<2x5xf32>
    %529 = arith.addf %525, %528 : vector<2x5xf32>
    %530 = vector.extract_strided_slice %76 {offsets = [0, 19], sizes = [2, 1], strides = [1, 1]} : vector<2x30xf32> to vector<2x1xf32>
    %531 = vector.broadcast %530 : vector<2x1xf32> to vector<2x5xf32>
    %532 = arith.mulf %531, %91 : vector<2x5xf32>
    %533 = arith.addf %529, %532 : vector<2x5xf32>
    %534 = vector.extract_strided_slice %75 {offsets = [0, 29], sizes = [2, 1], strides = [1, 1]} : vector<2x30xf32> to vector<2x1xf32>
    %535 = vector.broadcast %534 : vector<2x1xf32> to vector<2x5xf32>
    %536 = arith.mulf %535, %85 : vector<2x5xf32>
    %537 = arith.addf %533, %536 : vector<2x5xf32>
    %538 = vector.extract_strided_slice %76 {offsets = [0, 29], sizes = [2, 1], strides = [1, 1]} : vector<2x30xf32> to vector<2x1xf32>
    %539 = vector.broadcast %538 : vector<2x1xf32> to vector<2x5xf32>
    %540 = arith.mulf %539, %94 : vector<2x5xf32>
    %541 = arith.addf %537, %540 : vector<2x5xf32>
    %542 = vector.extract_strided_slice %517 {offsets = [0, 0], sizes = [2, 1], strides = [1, 1]} : vector<2x5xf32> to vector<2x1xf32>
    %543 = vector.broadcast %542 : vector<2x1xf32> to vector<2x5xf32>
    %544 = arith.mulf %543, %97 : vector<2x5xf32>
    %545 = arith.addf %541, %544 : vector<2x5xf32>
    %546 = vector.extract_strided_slice %517 {offsets = [0, 1], sizes = [2, 1], strides = [1, 1]} : vector<2x5xf32> to vector<2x1xf32>
    %547 = vector.broadcast %546 : vector<2x1xf32> to vector<2x5xf32>
    %548 = arith.mulf %547, %100 : vector<2x5xf32>
    %549 = arith.addf %545, %548 : vector<2x5xf32>
    %550 = vector.extract_strided_slice %517 {offsets = [0, 2], sizes = [2, 1], strides = [1, 1]} : vector<2x5xf32> to vector<2x1xf32>
    %551 = vector.broadcast %550 : vector<2x1xf32> to vector<2x5xf32>
    %552 = arith.mulf %551, %103 : vector<2x5xf32>
    %553 = arith.addf %549, %552 : vector<2x5xf32>
    %554 = vector.extract_strided_slice %517 {offsets = [0, 3], sizes = [2, 1], strides = [1, 1]} : vector<2x5xf32> to vector<2x1xf32>
    %555 = vector.broadcast %554 : vector<2x1xf32> to vector<2x5xf32>
    %556 = arith.mulf %555, %106 : vector<2x5xf32>
    %557 = arith.addf %553, %556 : vector<2x5xf32>
    %558 = vector.extract_strided_slice %517 {offsets = [0, 4], sizes = [2, 1], strides = [1, 1]} : vector<2x5xf32> to vector<2x1xf32>
    %559 = vector.broadcast %558 : vector<2x1xf32> to vector<2x5xf32>
    %560 = arith.mulf %559, %109 : vector<2x5xf32>
    %561 = arith.addf %557, %560 : vector<2x5xf32>
    %562 = math.tanh %561 : vector<2x5xf32>
    %563 = vector.shape_cast %6 : vector<1x40xf32> to vector<1x40xf32>
    %564 = vector.broadcast %563 : vector<1x40xf32> to vector<2x40xf32>
    %565 = vector.extract_strided_slice %562 {offsets = [0, 0], sizes = [2, 1], strides = [1, 1]} : vector<2x5xf32> to vector<2x1xf32>
    %566 = vector.extract_strided_slice %10 {offsets = [0, 0], sizes = [1, 40], strides = [1, 1]} : vector<5x40xf32> to vector<1x40xf32>
    %567 = vector.shape_cast %566 : vector<1x40xf32> to vector<1x40xf32>
    %568 = vector.broadcast %567 : vector<1x40xf32> to vector<2x40xf32>
    %569 = vector.broadcast %565 : vector<2x1xf32> to vector<2x40xf32>
    %570 = arith.mulf %569, %568 : vector<2x40xf32>
    %571 = arith.addf %564, %570 : vector<2x40xf32>
    %572 = vector.extract_strided_slice %562 {offsets = [0, 1], sizes = [2, 1], strides = [1, 1]} : vector<2x5xf32> to vector<2x1xf32>
    %573 = vector.extract_strided_slice %10 {offsets = [1, 0], sizes = [1, 40], strides = [1, 1]} : vector<5x40xf32> to vector<1x40xf32>
    %574 = vector.shape_cast %573 : vector<1x40xf32> to vector<1x40xf32>
    %575 = vector.broadcast %574 : vector<1x40xf32> to vector<2x40xf32>
    %576 = vector.broadcast %572 : vector<2x1xf32> to vector<2x40xf32>
    %577 = arith.mulf %576, %575 : vector<2x40xf32>
    %578 = arith.addf %571, %577 : vector<2x40xf32>
    %579 = vector.extract_strided_slice %562 {offsets = [0, 2], sizes = [2, 1], strides = [1, 1]} : vector<2x5xf32> to vector<2x1xf32>
    %580 = vector.extract_strided_slice %10 {offsets = [2, 0], sizes = [1, 40], strides = [1, 1]} : vector<5x40xf32> to vector<1x40xf32>
    %581 = vector.shape_cast %580 : vector<1x40xf32> to vector<1x40xf32>
    %582 = vector.broadcast %581 : vector<1x40xf32> to vector<2x40xf32>
    %583 = vector.broadcast %579 : vector<2x1xf32> to vector<2x40xf32>
    %584 = arith.mulf %583, %582 : vector<2x40xf32>
    %585 = arith.addf %578, %584 : vector<2x40xf32>
    %586 = vector.extract_strided_slice %562 {offsets = [0, 3], sizes = [2, 1], strides = [1, 1]} : vector<2x5xf32> to vector<2x1xf32>
    %587 = vector.extract_strided_slice %10 {offsets = [3, 0], sizes = [1, 40], strides = [1, 1]} : vector<5x40xf32> to vector<1x40xf32>
    %588 = vector.shape_cast %587 : vector<1x40xf32> to vector<1x40xf32>
    %589 = vector.broadcast %588 : vector<1x40xf32> to vector<2x40xf32>
    %590 = vector.broadcast %586 : vector<2x1xf32> to vector<2x40xf32>
    %591 = arith.mulf %590, %589 : vector<2x40xf32>
    %592 = arith.addf %585, %591 : vector<2x40xf32>
    %593 = vector.extract_strided_slice %562 {offsets = [0, 4], sizes = [2, 1], strides = [1, 1]} : vector<2x5xf32> to vector<2x1xf32>
    %594 = vector.extract_strided_slice %10 {offsets = [4, 0], sizes = [1, 40], strides = [1, 1]} : vector<5x40xf32> to vector<1x40xf32>
    %595 = vector.shape_cast %594 : vector<1x40xf32> to vector<1x40xf32>
    %596 = vector.broadcast %595 : vector<1x40xf32> to vector<2x40xf32>
    %597 = vector.broadcast %593 : vector<2x1xf32> to vector<2x40xf32>
    %598 = arith.mulf %597, %596 : vector<2x40xf32>
    %599 = arith.addf %592, %598 : vector<2x40xf32>
    %c0_19 = arith.constant 0 : index
    %c0_20 = arith.constant 0 : index
    %600 = vector.load %arg4[%c0_19, %c0_20] : memref<2x40xf32, #tpu.memory_space<vmem>>, vector<2x40xf32>
    tpu.vector_store %arg4[%c0_19, %c0_20], %599 {strides = array<i32>} : memref<2x40xf32, #tpu.memory_space<vmem>>, vector<2x40xf32>,
    return
  }
}

</mosaic_0001>

<bundles_post_ra>
// kernel: mtan_forward.1
= control target key start
LH: loop header
LB: loop body
LE: loop exit
PB: predicated region body
PF: predicated region fallthrough
CT: control target
= control target key end

     0   :  { %v1824_v0 = vmov 0   ;;  %vm498_vm0 = vcmask 1044480   ;;  %v46_v6 = vlaneseq  ;;  %v1825_v54 = vmov 683565275   ;;  %s1832_s27 = smov 123   ;;  %s1833_s28 = smov 10   ;;  %s2593_s2 = inlined_call_operand.vmem [shape: f32[32,1], index: 2, kind: input, shape index: {}]   ;;  %s2594_s3 = inlined_call_operand.vmem [shape: f32[37,40], index: 3, kind: input, shape index: {}]   ;;  %s2595_s1 = inlined_call_operand.vmem [shape: f32[16,30], index: 1, kind: input, shape index: {}]   ;;  %s2596_s0 = inlined_call_operand.vmem [shape: f32[16,30], index: 0, kind: input, shape index: {}]   ;;  %s2597_s4 = inlined_call_operand.vmem [shape: f32[2,40], index: 4, kind: output, shape index: {}]  }
   0x1   :  { %1680 = vset.pattern.permute.xlu1 %v1824_v0  ;;  %1679 = vset.pattern.permute.xlu0 %v1824_v0  ;;  %v24_v1 = vld [vmem:[%s2593_s2 + $0x10] sm:$0xff]  ;;  %v22_v2 = vld [vmem:[%s2593_s2] sm:$0xff]  ;;  %v25_v3 = vld [vmem:[%s2593_s2 + $0x18] sm:$0xff]  ;;  %v1826_v56 = vmov 2475754826   ;;  %s1834_s29 = smov 20  }
   0x2   :  { %38 = vperm.xlu1 %1680, %v24_v1   ;;  %28 = vperm.xlu0 %1679, %v22_v2   ;;  %v23_v4 = vld [vmem:[%s2593_s2 + $0x8] sm:$0xff]  ;;  %v1907_v7 = vshrl.u32 %v46_v6, 7  ;;  %v1915_v9 = vld [vmem:[%s2594_s3] sm:$0xff]  ;;  %v1827_v60 = vmov 2131351028   ;;  %s1831_s2 = smov 5  }
   0x3   :  { %v18_v5 = vld [vmem:[%s2594_s3 + $0x8] sm:$0xff]  ;;  %v1828_v62 = vmov 2102212464  }
   0x4   :  { %1602 = vmatprep.subr.msk.mxu0 %vm498_vm0, %v18_v5  ;;  %v1910_v8 = vsub.s32 0, %v1907_v7  ;;  %v1918_v10 = vsub.s32 1, %v1907_v7 }
   0x5   :  { %1603 = vmatpush3.msk.msra.mxu0 %vm498_vm0, %v18_v5 }
   0x6   :  { %43 = vperm.xlu1 %1680, %v25_v3   ;;  %33 = vperm.xlu0 %1679, %v23_v4   ;;  %v49_v11 = vrot.slane %v1915_v9, %v1910_v8  ;;  %v57_v12 = vrot.slane %v1915_v9, %v1918_v10  ;;  %v1829_v4 = vmov 920167782  }
  0x81   :  { %v39_v13 = vpop.permute.xlu1 %38  ;;  %v29_v14 = vpop.permute.xlu0 %28 }
  0x82   :  { %v52_v15 = vmul.f32 %v49_v11, %v39_v13  ;;  %v50_v16 = vmul.f32 %v49_v11, %v29_v14  ;;  %v1830_v14 = vmov 1326507024  }
  0x84   :  { %v1924_v17 = vadd.f32 %v57_v12, %v52_v15  ;;  %v1926_v18 = vadd.f32 %v57_v12, %v50_v16 }
  0x85   :  { %v44_v19 = vpop.permute.xlu1 %43  ;;  %v34_v20 = vpop.permute.xlu0 %33 }
  0x86   :  { %v276_v21 = vand.u32 2139095040, %v1924_v17  ;;  %v68_v22 = vand.u32 2139095040, %v1926_v18  ;;  %v53_v23 = vmul.f32 %v49_v11, %v44_v19  ;;  %v51_v24 = vmul.f32 %v49_v11, %v34_v20 }
  0x87   :  { %v65_v25 = vand.u32 2147483647, %v1926_v18  ;;  %v273_v48 = vand.u32 2147483647, %v1924_v17  ;;  %vm67_vm14 = vcmp.lt.s32.totalorder %v1926_v18, 0 }
  0x88   :  { %v277_v26 = vshrl.u32 %v276_v21, 23  ;;  %v69_v27 = vshrl.u32 %v68_v22, 23  ;;  %v1931_v28 = vadd.f32 %v57_v12, %v53_v23  ;;  %v1933_v29 = vadd.f32 %v57_v12, %v51_v24 }
  0x89   :  { %v72_v33 = vand.u32 8388607, %v65_v25  ;;  %vm2039_vm0 = vcmp.le.f32.partialorder %v65_v25, 0.7853982 }
  0x8a   :  { %v1576_v30 = vadd.s32 4294967169, %v277_v26  ;;  %v1568_v31 = vadd.s32 4294967169, %v69_v27  ;;  %v172_v32 = vand.u32 2139095040, %v1933_v29  ;;  %v380_v34 = vand.u32 2139095040, %v1931_v28 }
  0x8b   :  { %v169_v35 = vand.u32 2147483647, %v1933_v29  ;;  %v73_v40 = vor.u32 8388608, %v72_v33 }
  0x8c   :  { %v283_v36 = vadd.s32 1, %v1576_v30  ;;  %v75_v37 = vadd.s32 1, %v1568_v31  ;;  %v173_v38 = vshrl.u32 %v172_v32, 23  ;;  %v381_v42 = vshrl.u32 %v380_v34, 23 }
  0x8d   :  { %v1942_v43 = vand.u32 8388607, %v169_v35  ;;  %v1944_v47 = vshll.u32 %v73_v40, 8 }
  0x8e   :  { %vm76_vm1 = vcmp.gt.s32.totalorder %v75_v37, 0  ;;  %v1572_v39 = vadd.s32 4294967169, %v173_v38  ;;  %vm284_vm2 = vcmp.gt.s32.totalorder %v283_v36, 0  ;;  %v1949_v50 = vadd.s32 4294967169, %v381_v42 }
  0x8f   :  { %v77_v41 = vsel %vm76_vm1, %v75_v37, 0  ;;  %v1947_v49 = vsel %vm284_vm2, %v283_v36, 0  ;;  %v177_v51 = vor.u32 8388608, %v1942_v43 }
  0x90   :  { %v79_v44 = vand.u32 31, %v77_v41  ;;  %v179_v45 = vadd.s32 1, %v1572_v39  ;;  %v78_v52 = vshrl.u32 %v77_v41, 5  ;;  %v1964_v33 = vand.u32 31, %v1947_v49 }
  0x92   :  { %v80_v46 = vsub.s32 32, %v79_v44  ;;  %vm180_vm3 = vcmp.gt.s32.totalorder %v179_v45, 0  ;;  %v82_v55 = vshll.u32 %v1825_v54, %v79_v44  ;;  %v85_v59 = vshll.u32 %v1826_v56, %v79_v44 }
  0x93   :  { %v181_v53 = vsel %vm180_vm3, %v179_v45, 0  ;;  %v88_v61 = vshll.u32 %v1827_v60, %v79_v44  ;;  %v91_v63 = vshll.u32 %v1828_v62, %v79_v44  ;;  %v94_v13 = vshll.u32 %v1829_v4, %v79_v44 }
  0x94   :  { %v83_v57 = vshrl.u32 %v1826_v56, %v80_v46  ;;  %v183_v58 = vand.u32 31, %v181_v53  ;;  %v86_v2 = vshrl.u32 %v1827_v60, %v80_v46  ;;  %v89_v3 = vshrl.u32 %v1828_v62, %v80_v46 }
  0x95   :  { %v92_v5 = vshrl.u32 %v1829_v4, %v80_v46  ;;  %v81_v12 = vshrl.u32 %v1825_v54, %v80_v46  ;;  %v95_v15 = vshrl.u32 %v1830_v14, %v80_v46  ;;  %vm97_vm4 = vcmp.lt.s32.totalorder %v78_v52, 1 }
  0x96   :  { %v84_v1 = vor.u32 %v83_v57, %v82_v55  ;;  %v184_v11 = vsub.s32 32, %v183_v58  ;;  %v87_v16 = vor.u32 %v86_v2, %v85_v59  ;;  %v90_v19 = vor.u32 %v89_v3, %v88_v61 }
  0x97   :  { %v93_v20 = vor.u32 %v92_v5, %v91_v63  ;;  %v96_v21 = vor.u32 %v95_v15, %v94_v13  ;;  %vm98_vm5 = vcmp.lt.s32.totalorder %v78_v52, 2  ;;  %vm99_vm6 = vcmp.lt.s32.totalorder %v78_v52, 3 }
  0x98   :  { %vm100_vm7 = vcmp.lt.s32.totalorder %v78_v52, 4  ;;  %v101_v22 = vsel %vm97_vm4, %v81_v12, %v84_v1  ;;  %v105_v24 = vsel %vm97_vm4, %v84_v1, %v87_v16  ;;  %v109_v31 = vsel %vm97_vm4, %v87_v16, %v90_v19 }
  0x99   :  { %v102_v23 = vsel %vm100_vm7, %v90_v19, 2102212464  ;;  %v106_v26 = vsel %vm100_vm7, %v93_v20, 920167782  ;;  %v110_v32 = vsel %vm100_vm7, %v96_v21, 1326507024  ;;  %v186_v45 = vshll.u32 %v1825_v54, %v183_v58 }
  0x9a   :  { %v103_v27 = vsel %vm99_vm6, %v87_v16, %v102_v23  ;;  %v107_v30 = vsel %vm99_vm6, %v90_v19, %v106_v26  ;;  %v182_v34 = vshrl.u32 %v181_v53, 5  ;;  %v111_v37 = vsel %vm99_vm6, %v93_v20, %v110_v32 }
  0x9b   :  { %v108_v36 = vsel %vm98_vm5, %v105_v24, %v107_v30  ;;  %v104_v38 = vsel %vm98_vm5, %v101_v22, %v103_v27  ;;  %v112_v39 = vsel %vm98_vm5, %v109_v31, %v111_v37  ;;  %v187_v46 = vshrl.u32 %v1826_v56, %v184_v11 }
  0x9c   :  { %v1970_v40 = vmul.u32.u64.low %v1944_v47, %v108_v36  ;;  %v1971_v41 = vmul.u32.u64.high %v1944_v47, %v108_v36, %v1970_v40  ;;  %v1975_v42 = vmul.u32.u64.low %v1944_v47, %v112_v39  ;;  %v1976_v44 = vmul.u32.u64.high %v1944_v47, %v112_v39, %v1975_v42 }
  0x9d   :  { %v189_v53 = vshll.u32 %v1826_v56, %v183_v58  ;;  %v190_v55 = vshrl.u32 %v1827_v60, %v184_v11  ;;  %v192_v52 = vshll.u32 %v1827_v60, %v183_v58  ;;  %v193_v57 = vshrl.u32 %v1828_v62, %v184_v11 }
  0x9e   :  { %v188_v59 = vor.u32 %v187_v46, %v186_v45  ;;  %v195_v61 = vshll.u32 %v1828_v62, %v183_v58  ;;  %v196_v63 = vshrl.u32 %v1829_v4, %v184_v11  ;;  %v198_v1 = vshll.u32 %v1829_v4, %v183_v58 }
  0x9f   :  { %v123_v2 = vadd.s32 1, %v1971_v41  ;;  %v191_v3 = vor.u32 %v190_v55, %v189_v53  ;;  %v194_v5 = vor.u32 %v193_v57, %v192_v52  ;;  %v199_v12 = vshrl.u32 %v1830_v14, %v184_v11 }
  0xa0   :  { %v120_v13 = vmul.u32 %v1944_v47, %v104_v38  ;;  %vm122_vm8 = vc.u32 %v1976_v44, %v1970_v40  ;;  %v197_v15 = vor.u32 %v196_v63, %v195_v61  ;;  %v217_v16 = vshll.u32 %v177_v51, 8 }
  0xa1   :  { %v124_v19 = vsel %vm122_vm8, %v123_v2, %v1971_v41  ;;  %v185_v20 = vshrl.u32 %v1825_v54, %v184_v11  ;;  %v200_v58 = vor.u32 %v199_v12, %v198_v1  ;;  %vm201_vm9 = vcmp.lt.s32.totalorder %v182_v34, 1 }
  0xa2   :  { %v125_v21 = vadd.s32 %v124_v19, %v120_v13  ;;  %vm203_vm10 = vcmp.lt.s32.totalorder %v182_v34, 3  ;;  %vm204_vm11 = vcmp.lt.s32.totalorder %v182_v34, 4  ;;  %v209_v22 = vsel %vm201_vm9, %v188_v59, %v191_v3 }
  0xa3   :  { %v206_v23 = vsel %vm204_vm11, %v194_v5, 2102212464  ;;  %v210_v24 = vsel %vm204_vm11, %v197_v15, 920167782  ;;  %v213_v47 = vsel %vm201_vm9, %v191_v3, %v194_v5  ;;  %v214_v26 = vsel %vm204_vm11, %v200_v58, 1326507024 }
  0xa4   :  { %v126_v27 = vadd.s32 536870912, %v125_v21  ;;  %vm202_vm12 = vcmp.lt.s32.totalorder %v182_v34, 2  ;;  %v211_v30 = vsel %vm203_vm10, %v194_v5, %v210_v24  ;;  %v215_v43 = vsel %vm203_vm10, %v197_v15, %v214_v26 }
  0xa5   :  { %v288_v51 = vsub.s32 32, %v1964_v33  ;;  %v205_v31 = vsel %vm201_vm9, %v185_v20, %v188_v59  ;;  %v212_v11 = vsel %vm202_vm12, %v209_v22, %v211_v30  ;;  %v216_v32 = vsel %vm202_vm12, %v213_v47, %v215_v43 }
  0xa6   :  { %v127_v36 = vshrl.u32 %v126_v27, 30  ;;  %v207_v37 = vsel %vm203_vm10, %v191_v3, %v206_v23  ;;  %v2000_v38 = vmul.u32.u64.low %v217_v16, %v216_v32  ;;  %v2001_v39 = vmul.u32.u64.high %v217_v16, %v216_v32, %v2000_v38 }
  0xa7   :  { %v2003_v41 = vmul.u32.u64.low %v217_v16, %v212_v11  ;;  %v2004_v42 = vmul.u32.u64.high %v217_v16, %v212_v11, %v2003_v41  ;;  %v387_v45 = vadd.s32 1, %v1949_v50  ;;  %v280_v53 = vand.u32 8388607, %v273_v48 }
  0xa8   :  { %v128_v46 = vshll.u32 %v127_v36, 30  ;;  %v208_v55 = vsel %vm202_vm12, %v205_v31, %v207_v37  ;;  %v293_v52 = vshll.u32 %v1826_v56, %v1964_v33  ;;  %v294_v34 = vshrl.u32 %v1827_v60, %v288_v51 }
  0xa9   :  { %v296_v57 = vshll.u32 %v1827_v60, %v1964_v33  ;;  %vm226_vm13 = vc.u32 %v2001_v39, %v2003_v41  ;;  %v297_v50 = vshrl.u32 %v1828_v62, %v288_v51  ;;  %v299_v61 = vshll.u32 %v1828_v62, %v1964_v33 }
  0xaa   :  { %v2015_v59 = vsub.s32 %v125_v21, %v128_v46  ;;  %v2023_v63 = vshrl.u32 %v1947_v49, 5  ;;  %v227_v1 = vadd.s32 1, %v2004_v42  ;;  %v290_v2 = vshll.u32 %v1825_v54, %v1964_v33 }
  0xab   :  { %v291_v3 = vshrl.u32 %v1826_v56, %v288_v51  ;;  %v224_v12 = vmul.u32 %v217_v16, %v208_v55  ;;  %v300_v13 = vshrl.u32 %v1829_v4, %v288_v51  ;;  %v302_v15 = vshll.u32 %v1829_v4, %v1964_v33 }
  0xac   :  { %v131_v5 = vsub.s32 0, %v2015_v59  ;;  %vm388_vm15 = vcmp.gt.s32.totalorder %v387_v45, 0  ;;  %v228_v49 = vsel %vm226_vm13, %v227_v1, %v2004_v42  ;;  %v295_v19 = vor.u32 %v294_v34, %v293_v52 }
  0xad   :  { %v303_v20 = vshrl.u32 %v1830_v14, %v288_v51  ;;  %v229_v21 = vadd.s32 %v228_v49, %v224_v12  ;;  %v298_v22 = vor.u32 %v297_v50, %v296_v57  ;;  %v301_v23 = vor.u32 %v300_v13, %v299_v61 }
  0xae   :  { %v1569_v58 = vmin.u32 %v131_v5, %v2015_v59  ;;  %v281_v24 = vor.u32 8388608, %v280_v53  ;;  %v292_v47 = vor.u32 %v291_v3, %v290_v2  ;;  %v389_v26 = vsel %vm388_vm15, %v387_v45, 0 }
  0xaf   :  { %v304_v33 = vor.u32 %v303_v20, %v302_v15  ;;  %v151_v30 = vsub.s32 4, %v127_v36  ;;  %vm308_vm1 = vcmp.lt.s32.totalorder %v2023_v63, 4  ;;  %v121_v43 = vadd.s32 %v1970_v40, %v1976_v44 }
  0xb0   :  { %v133_v27 = vclz %v1569_v58  ;;  %v230_v31 = vadd.s32 536870912, %v229_v21  ;;  %vm305_vm2 = vcmp.lt.s32.totalorder %v2023_v63, 1  ;;  %v314_v25 = vsel %vm308_vm1, %v301_v23, 920167782 }
  0xb1   :  { %v289_v32 = vshrl.u32 %v1825_v54, %v288_v51  ;;  %vm307_vm3 = vcmp.lt.s32.totalorder %v2023_v63, 3  ;;  %v317_v37 = vsel %vm305_vm2, %v295_v19, %v298_v22  ;;  %v313_v42 = vsel %vm305_vm2, %v292_v47, %v295_v19 }
  0xb2   :  { %v1570_v11 = vadd.s32 4294967294, %v133_v27  ;;  %v2053_v38 = vshrl.u32 %v230_v31, 30  ;;  %v315_v40 = vsel %vm307_vm3, %v298_v22, %v314_v25  ;;  %v318_v44 = vsel %vm308_vm1, %v304_v33, 1326507024 }
  0xb3   :  { %v152_v51 = vsel %vm67_vm14, %v151_v30, %v127_v36  ;;  %vm306_vm5 = vcmp.lt.s32.totalorder %v2023_v63, 2  ;;  %v319_v45 = vsel %vm307_vm3, %v301_v23, %v318_v44  ;;  %v321_v52 = vshll.u32 %v281_v24, 8 }
  0xb4   :  { %vm1571_vm4 = vcmp.lt.s32.totalorder %v1570_v11, 0  ;;  %v232_v53 = vshll.u32 %v2053_v38, 30  ;;  %v320_v55 = vsel %vm306_vm5, %v317_v37, %v319_v45  ;;  %v310_v50 = vsel %vm308_vm1, %v298_v22, 2102212464 }
  0xb5   :  { %v136_v46 = vsel %vm1571_vm4, 0, %v1570_v11  ;;  %v316_v36 = vsel %vm306_vm5, %v313_v42, %v315_v40  ;;  %v154_v61 = vsel %vm2039_vm0, 0, %v152_v51  ;;  %v309_v15 = vsel %vm305_vm2, %v289_v32, %v292_v47 }
  0xb6   :  { %v137_v34 = vsub.s32 32, %v136_v46  ;;  %v141_v57 = vsub.s32 4294967266, %v136_v46  ;;  %v233_v1 = vsub.s32 %v229_v21, %v232_v53  ;;  %v138_v5 = vshll.u32 %v2015_v59, %v136_v46 }
  0xb7   :  { %v2075_v2 = vmul.u32.u64.low %v321_v52, %v320_v55  ;;  %v2076_v3 = vmul.u32.u64.high %v321_v52, %v320_v55, %v2075_v2  ;;  %v311_v20 = vsel %vm307_vm3, %v295_v19, %v310_v50  ;;  %v2087_v23 = vand.u32 31, %v389_v26 }
  0xb8   :  { %v139_v12 = vshrl.u32 %v121_v43, %v137_v34  ;;  %v142_v13 = vadd.s32 127, %v141_v57  ;;  %v235_v49 = vsub.s32 0, %v233_v1  ;;  %v158_v59 = vadd.s32 3, %v154_v61 }
  0xb9   :  { %v2083_v58 = vmul.u32.u64.low %v321_v52, %v316_v36  ;;  %v2084_v22 = vmul.u32.u64.high %v321_v52, %v316_v36, %v2083_v58  ;;  %v312_v30 = vsel %vm306_vm5, %v309_v15, %v311_v20  ;;  %v377_v19 = vand.u32 2147483647, %v1931_v28 }
  0xba   :  { %v140_v21 = vor.u32 %v139_v12, %v138_v5  ;;  %v143_v24 = vshll.u32 %v142_v13, 23  ;;  %v1573_v33 = vmin.u32 %v235_v49, %v233_v1  ;;  %v2095_v47 = vsub.s32 32, %v2087_v23 }
  0xbb   :  { %vm330_vm6 = vc.u32 %v2076_v3, %v2083_v58  ;;  %v331_v11 = vadd.s32 1, %v2084_v22  ;;  %v2098_v32 = vshrl.u32 %v389_v26, 5  ;;  %v2101_v37 = vand.u32 127, %v46_v6 }
  0xbc   :  { %v144_v27 = vor.u32 4788187, %v143_v24  ;;  %v237_v43 = vclz %v1573_v33  ;;  %v147_v25 = vcvt.s32.f32 %v140_v21  ;;  %v328_v42 = vmul.u32 %v321_v52, %v312_v30 }
  0xbd   :  { %v2103_v44 = vand.u32 3, %v158_v59  ;;  %v225_v51 = vadd.s32 %v2003_v41, %v2001_v39  ;;  %v332_v45 = vsel %vm330_vm6, %v331_v11, %v2084_v22  ;;  %vm171_vm7 = vcmp.lt.s32.totalorder %v1933_v29, 0 }
  0xbe   :  { %v145_v31 = vand.u32 2147483647, %v144_v27  ;;  %v1574_v63 = vadd.s32 4294967294, %v237_v43  ;;  %v255_v46 = vsub.s32 4, %v2053_v38  ;;  %v333_v26 = vadd.s32 %v332_v45, %v328_v42 }
  0xbf   :  { %v2112_v6 = vand.u32 8388607, %v377_v19  ;;  %v397_v52 = vshll.u32 %v1826_v56, %v2087_v23  ;;  %v398_v39 = vshrl.u32 %v1827_v60, %v2095_v47  ;;  %v401_v50 = vshrl.u32 %v1828_v62, %v2095_v47 }
  0xc0   :  { %v148_v40 = vmul.f32 %v147_v25, %v145_v31  ;;  %vm1575_vm8 = vcmp.lt.s32.totalorder %v1574_v63, 0  ;;  %v334_v57 = vadd.s32 536870912, %v333_v26  ;;  %v404_v2 = vshrl.u32 %v1829_v4, %v2095_v47 }
  0xc1   :  { %v240_v55 = vsel %vm1575_vm8, 0, %v1574_v63  ;;  %v407_v5 = vshrl.u32 %v1830_v14, %v2095_v47  ;;  %v400_v20 = vshll.u32 %v1827_v60, %v2087_v23  ;;  %v406_v22 = vshll.u32 %v1829_v4, %v2087_v23 }
  0xc2   :  { %v149_v53 = vxor.u32 2147483648, %v148_v40  ;;  %v241_v41 = vsub.s32 32, %v240_v55  ;;  %v245_v34 = vsub.s32 4294967266, %v240_v55  ;;  %v242_v61 = vshll.u32 %v233_v1, %v240_v55 }
  0xc3   :  { %v2129_v49 = vshrl.u32 %v334_v57, 30  ;;  %v403_v1 = vshll.u32 %v1828_v62, %v2087_v23  ;;  %v395_v24 = vshrl.u32 %v1826_v56, %v2095_v47  ;;  %v2140_v33 = vor.u32 %v398_v39, %v397_v52 }
  0xc4   :  { %v150_v36 = vsel %vm67_vm14, %v149_v53, %v148_v40  ;;  %v243_v13 = vshrl.u32 %v225_v51, %v241_v41  ;;  %v246_v15 = vadd.s32 127, %v245_v34  ;;  %v402_v27 = vor.u32 %v401_v50, %v400_v20 }
  0xc5   :  { %v153_v12 = vsel %vm2039_vm0, %v1926_v18, %v150_v36  ;;  %v336_v16 = vshll.u32 %v2129_v49, 30  ;;  %v408_v59 = vor.u32 %v407_v5, %v406_v22  ;;  %vm2144_vm9 = vcmp.le.f32.partialorder %v169_v35, 0.7853982 }
  0xc6   :  { %1778 = vcosq.f32 %v153_v12  ;;  %v244_v14 = vor.u32 %v243_v13, %v242_v61  ;;  %v247_v21 = vshll.u32 %v246_v15, 23  ;;  %v405_v30 = vor.u32 %v404_v2, %v403_v1 }
  0xc7   :  { %1780 = vsinq.f32 %v153_v12  ;;  %v2148_v4 = vsub.s32 %v333_v26, %v336_v16  ;;  %vm164_vm10 = vcmp.eq.s32.totalorder %v2103_v44, 2  ;;  %v256_v56 = vsel %vm171_vm7, %v255_v46, %v2053_v38 }
  0xc8   :  { %v248_v62 = vor.u32 4788187, %v247_v21  ;;  %v385_v43 = vor.u32 8388608, %v2112_v6  ;;  %v394_v31 = vshll.u32 %v1825_v54, %v2087_v23  ;;  %vm409_vm11 = vcmp.lt.s32.totalorder %v2098_v32, 1 }
  0xc9   :  { %vm161_vm12 = vcmp.eq.s32.totalorder %v2103_v44, 0  ;;  %v251_v25 = vcvt.s32.f32 %v244_v14  ;;  %v339_v11 = vsub.s32 0, %v2148_v4  ;;  %vm412_vm13 = vcmp.lt.s32.totalorder %v2098_v32, 4 }
  0xca   :  { %v249_v35 = vand.u32 2147483647, %v248_v62  ;;  %vm64_vm14 = vcmp.eq.s32.totalorder %v2101_v37, 0  ;;  %vm160_vm15 = vcmp.lt.s32.totalorder %v2103_v44, 2  ;;  %v396_v38 = vor.u32 %v395_v24, %v394_v31 }
  0xcb   :  { %vm411_vm0 = vcmp.lt.s32.totalorder %v2098_v32, 3  ;;  %v421_v23 = vsel %vm409_vm11, %v2140_v33, %v402_v27  ;;  %v422_v63 = vsel %vm412_vm13, %v408_v59, 1326507024  ;;  %vm157_vm1 = vweird.f32 %v1926_v18 }
  0xcc   :  { %vm485_vm2 = vcmask 39936   ;;  %v252_v42 = vmul.f32 %v251_v25, %v249_v35  ;;  %v1577_v40 = vmin.u32 %v339_v11, %v2148_v4  ;;  %v418_v51 = vsel %vm412_vm13, %v405_v30, 920167782 }
  0xcd   :  { %v423_v45 = vsel %vm411_vm0, %v405_v30, %v422_v63  ;;  %v258_v46 = vsel %vm2144_vm9, 0, %v256_v56  ;;  %v329_v26 = vadd.s32 %v2083_v58, %v2076_v3  ;;  %v393_v6 = vshrl.u32 %v1825_v54, %v2095_v47 }
  0xce   :  { %vm410_vm3 = vcmp.lt.s32.totalorder %v2098_v32, 2  ;;  %v253_v53 = vxor.u32 2147483648, %v252_v42  ;;  %v341_v55 = vclz %v1577_v40  ;;  %v2185_v39 = vsub.s32 3, %v1907_v7 }
  0xcf   :  { %v424_v52 = vsel %vm410_vm3, %v421_v23, %v423_v45  ;;  %v414_v34 = vsel %vm412_vm13, %v402_v27, 2102212464  ;;  %v417_v3 = vsel %vm409_vm11, %v396_v38, %v2140_v33  ;;  %v419_v54 = vsel %vm411_vm0, %v402_v27, %v418_v51 }
  0xd0   :  { %v1779_v41 = vpop.eup %1778  ;;  %v425_v58 = vshll.u32 %v385_v43, 8  ;;  %v254_v50 = vsel %vm171_vm7, %v253_v53, %v252_v42  ;;  %v1578_v36 = vadd.s32 4294967294, %v341_v55  ;;  %v596_v61 = vrot.slane %v1915_v9, %v2185_v39 }
  0xd1   :  { %v1781_v47 = vpop.eup %1780  ;;  %v165_v57 = vxor.u32 2147483648, %v1779_v41  ;;  %v257_v5 = vsel %vm2144_vm9, %v1933_v29, %v254_v50  ;;  %v420_v20 = vsel %vm410_vm3, %v417_v3, %v419_v54  ;;  %v413_v14 = vsel %vm409_vm11, %v393_v6, %v396_v38 }
  0xd2   :  { %v162_v2 = vxor.u32 2147483648, %v1781_v47  ;;  %v2201_v12 = vmul.u32.u64.low %v425_v58, %v424_v52  ;;  %v2202_v13 = vmul.u32.u64.high %v425_v58, %v424_v52, %v2201_v12  ;;  %1782 = vcosq.f32 %v257_v5  ;;  %598 = vrot.lane.b32.xlu0 %v596_v61, %s1831_s2 }
  0xd3   :  { %v166_v15 = vsel %vm164_vm10, %v165_v57, %v1781_v47  ;;  %vm1579_vm4 = vcmp.lt.s32.totalorder %v1578_v36, 0  ;;  %1784 = vsinq.f32 %v257_v5  ;;  %v415_v27 = vsel %vm411_vm0, %v2140_v33, %v414_v34 }
  0xd4   :  { %v163_v1 = vsel %vm161_vm12, %v1779_v41, %v162_v2  ;;  %v344_v22 = vsel %vm1579_vm4, 0, %v1578_v36  ;;  %v262_v60 = vadd.s32 3, %v258_v46  ;;  %v416_v33 = vsel %vm410_vm3, %v413_v14, %v415_v27 }
  0xd5   :  { %v167_v21 = vsel %vm160_vm15, %v163_v1, %v166_v15  ;;  %v345_v16 = vsub.s32 32, %v344_v22  ;;  %v349_v24 = vsub.s32 4294967266, %v344_v22  ;;  %v346_v44 = vshll.u32 %v2148_v4, %v344_v22 }
  0xd6   :  { %v168_v59 = vsel %vm157_vm1, nan, %v167_v21  ;;  %v2219_v62 = vmul.u32.u64.low %v425_v58, %v420_v20  ;;  %v2220_v30 = vmul.u32.u64.high %v425_v58, %v420_v20, %v2219_v62  ;;  %v263_v38 = vand.u32 3, %v262_v60 }
  0xd7   :  { %v481_v56 = vsel %vm64_vm14, %v1926_v18, %v168_v59  ;;  %v347_v43 = vshrl.u32 %v329_v26, %v345_v16  ;;  %v350_v31 = vadd.s32 127, %v349_v24  ;;  %v432_v63 = vmul.u32 %v425_v58, %v416_v33 }
  0xd8   :  { %1604 = vmatprep.mubr.msk.f32.mxu0 %vm485_vm2, %v481_v56  ;;  %vm434_vm5 = vc.u32 %v2202_v13, %v2219_v62  ;;  %v435_v11 = vadd.s32 1, %v2220_v30  ;;  %v359_v32 = vsub.s32 4, %v2129_v49  ;;  %vm268_vm6 = vcmp.eq.s32.totalorder %v263_v38, 2 }
  0xd9   :  { %v348_v35 = vor.u32 %v347_v43, %v346_v44  ;;  %v351_v25 = vshll.u32 %v350_v31, 23  ;;  %vm265_vm7 = vcmp.eq.s32.totalorder %v263_v38, 0  ;;  %vm275_vm8 = vcmp.lt.s32.totalorder %v1924_v17, 0 }
  0xda   :  { %v436_v18 = vsel %vm434_vm5, %v435_v11, %v2220_v30  ;;  %vm264_vm9 = vcmp.lt.s32.totalorder %v263_v38, 2  ;;  %vm261_vm10 = vweird.f32 %v1933_v29  ;;  %v360_v54 = vsel %vm275_vm8, %v359_v32, %v2129_v49 }
  0xdb   :  { %v352_v23 = vor.u32 4788187, %v351_v25  ;;  %v355_v40 = vcvt.s32.f32 %v348_v35  ;;  %v437_v51 = vadd.s32 %v436_v18, %v432_v63  ;;  %vm274_vm11 = vcmp.le.f32.partialorder %v273_v48, 0.7853982 }
  0xdc   :  { %v1783_v42 = vpop.eup %1782  ;;  %v362_v61 = vsel %vm274_vm11, 0, %v360_v54  ;;  %v433_v16 = vadd.s32 %v2219_v62, %v2202_v13  ;;  %vm365_vm1 = vweird.f32 %v1924_v17  ;;  %vm379_vm3 = vcmp.lt.s32.totalorder %v1931_v28, 0 }
  0xdd   :  { %v353_v4 = vand.u32 2147483647, %v352_v23  ;;  %v1785_v45 = vpop.eup %1784  ;;  %v269_v46 = vxor.u32 2147483648, %v1783_v42  ;;  %v438_v53 = vadd.s32 536870912, %v437_v51  ;;  %v366_v49 = vadd.s32 3, %v362_v61 }
  0xde   :  { %v266_v26 = vxor.u32 2147483648, %v1785_v45  ;;  %vm378_vm4 = vcmp.le.f32.partialorder %v377_v19, 0.7853982 }
  0xdf   :  { %v356_v6 = vmul.f32 %v355_v40, %v353_v4  ;;  %v270_v55 = vsel %vm268_vm6, %v269_v46, %v1785_v45  ;;  %v439_v34 = vshrl.u32 %v438_v53, 30  ;;  %v367_v20 = vand.u32 3, %v366_v49 }
  0xe0   :  { %v267_v52 = vsel %vm265_vm7, %v1783_v42, %v266_v26 }
  0xe1   :  { %v357_v41 = vxor.u32 2147483648, %v356_v6  ;;  %v271_v3 = vsel %vm264_vm9, %v267_v52, %v270_v55  ;;  %v440_v57 = vshll.u32 %v439_v34, 30  ;;  %vm372_vm13 = vcmp.eq.s32.totalorder %v367_v20, 2  ;;  %vm1618_vm9 = vmpackc.low %vm485_vm2, %vm485_vm2 }
  0xe2   :  { %v272_v58 = vsel %vm261_vm10, nan, %v271_v3  ;;  %vm368_vm15 = vcmp.lt.s32.totalorder %v367_v20, 2  ;;  %vm369_vm0 = vcmp.eq.s32.totalorder %v367_v20, 0  ;;  %v463_v23 = vsub.s32 4, %v439_v34 }
  0xe3   :  { %v358_v47 = vsel %vm275_vm8, %v357_v41, %v356_v6  ;;  %v482_v50 = vsel %vm64_vm14, %v1933_v29, %v272_v58  ;;  %v441_v2 = vsub.s32 %v437_v51, %v440_v57  ;;  %vm469_vm8 = vweird.f32 %v1931_v28 }
  0xe4   :  { %v361_v36 = vsel %vm274_vm11, %v1924_v17, %v358_v47  ;;  %1605 = vmatmul.mubr.msk.f32.vlgmr.msra.gmra.mrb[0].mxu0 %vm485_vm2, %v482_v50  ;;  %v464_v42 = vsel %vm379_vm3, %v463_v23, %v439_v34  ;;  %v2259_v41 = vsub.s32 2, %v1907_v7  ;;  %vm722_vm11 = vcmask 244736  }
  0xe5   :  { %1786 = vcosq.f32 %v361_v36  ;;  %v443_v5 = vsub.s32 0, %v441_v2  ;;  %v466_v40 = vsel %vm378_vm4, 0, %v464_v42 }
  0xe6   :  { %1788 = vsinq.f32 %v361_v36  ;;  %v590_v34 = vrot.slane %v1915_v9, %v2259_v41 }
  0xe7   :  { %v1581_v12 = vmin.u32 %v443_v5, %v441_v2 }
  0xe9   :  { %v445_v15 = vclz %v1581_v12 }
  0xeb   :  { %v1582_v48 = vadd.s32 4294967294, %v445_v15  ;;  %v717_v15 = vld [vmem:[%s2595_s1 + $0x8] sm:$0xff] }
  0xec   :  { %vm719_vm10 = vcmp.eq.f32.partialorder %v717_v15, 0.0 }
  0xed   :  { %vm1583_vm12 = vcmp.lt.s32.totalorder %v1582_v48, 0 }
  0xee   :  { %v448_v29 = vsel %vm1583_vm12, 0, %v1582_v48  ;;  %v716_v48 = vld [vmem:[%s2595_s1] sm:$0xff] }
  0xef   :  { %v1787_v1 = vpop.eup %1786  ;;  %v449_v24 = vsub.s32 32, %v448_v29  ;;  %v453_v27 = vsub.s32 4294967266, %v448_v29  ;;  %v450_v30 = vshll.u32 %v441_v2, %v448_v29  ;;  %vm718_vm12 = vcmp.eq.f32.partialorder %v716_v48, 0.0 }
  0xf0   :  { %v1789_v22 = vpop.eup %1788  ;;  %v373_v14 = vxor.u32 2147483648, %v1787_v1 }
  0xf1   :  { %v370_v21 = vxor.u32 2147483648, %v1789_v22  ;;  %v451_v56 = vshrl.u32 %v433_v16, %v449_v24  ;;  %v454_v44 = vadd.s32 127, %v453_v27 }
  0xf2   :  { %v374_v59 = vsel %vm372_vm13, %v373_v14, %v1789_v22  ;;  %vm795_vm13 = vcmask 1040384  }
  0xf3   :  { %v371_v60 = vsel %vm369_vm0, %v1787_v1, %v370_v21  ;;  %v452_v33 = vor.u32 %v451_v56, %v450_v30  ;;  %v455_v35 = vshll.u32 %v454_v44, 23 }
  0xf4   :  { %v375_v43 = vsel %vm368_vm15, %v371_v60, %v374_v59  ;;  %vm1562_vm15 = vcmask 320512  }
  0xf5   :  { %v376_v31 = vsel %vm365_vm1, nan, %v375_v43  ;;  %v456_v13 = vor.u32 4788187, %v455_v35  ;;  %v459_v11 = vcvt.s32.f32 %v452_v33 }
  0xf6   :  { %v483_v25 = vsel %vm64_vm14, %v1924_v17, %v376_v31  ;;  %v470_v17 = vadd.s32 3, %v466_v40  ;;  %v714_v40 = vld [vmem:[%s2596_s0] sm:$0xff] }
  0xf7   :  { %1607 = vmatprep.mubr.msk.f32.mxu0 %vm485_vm2, %v483_v25  ;;  %v457_v62 = vand.u32 2147483647, %v456_v13 }
  0xf8   :  { %v471_v51 = vand.u32 3, %v470_v17 }
  0xf9   :  { %v460_v38 = vmul.f32 %v459_v11, %v457_v62 }
  0xfa   :  { %vm476_vm5 = vcmp.eq.s32.totalorder %v471_v51, 2  ;;  %vm473_vm6 = vcmp.eq.s32.totalorder %v471_v51, 0  ;;  %vm472_vm7 = vcmp.lt.s32.totalorder %v471_v51, 2 }
  0xfb   :  { %v461_v63 = vxor.u32 2147483648, %v460_v38 }
  0xfd   :  { %v462_v18 = vsel %vm379_vm3, %v461_v63, %v460_v38 }
  0xfe   :  { %v465_v4 = vsel %vm378_vm4, %v1931_v28, %v462_v18 }
  0xff   :  { %1790 = vcosq.f32 %v465_v4 }
 0x100   :  { %1792 = vsinq.f32 %v465_v4  ;;  %v715_v4 = vld [vmem:[%s2596_s0 + $0x8] sm:$0xff] }
 0x109   :  { %v1791_v45 = vpop.eup %1790 }
 0x10a   :  { %v1793_v46 = vpop.eup %1792  ;;  %v477_v32 = vxor.u32 2147483648, %v1791_v45 }
 0x10b   :  { %v474_v26 = vxor.u32 2147483648, %v1793_v46 }
 0x10c   :  { %v478_v6 = vsel %vm476_vm5, %v477_v32, %v1793_v46 }
 0x10d   :  { %v475_v53 = vsel %vm473_vm6, %v1791_v45, %v474_v26 }
 0x10e   :  { %v479_v19 = vsel %vm472_vm7, %v475_v53, %v478_v6 }
 0x10f   :  { %v480_v55 = vsel %vm469_vm8, nan, %v479_v19 }
 0x110   :  { %v484_v52 = vsel %vm64_vm14, %v1931_v28, %v480_v55  ;;  %vm708_vm14 = vcmask 80896  }
 0x111   :  { %1608 = vmatmul.mubr.msk.f32.gmra.mrb[2].mxu0 %vm485_vm2, %v484_v52 }
 0x144   :  { %v599_v37 = vpop.permute.xlu0 %598 }
 0x1b7   :  { %v1606_v3 = vpop.f32.mrb[0].mxu0 }
 0x1b8   :  { %v592_v54 = vadd.f32 %v1606_v3, %v590_v34  ;;  %v568_v58 = vpop.f32.mrb[1].mxu0 }
 0x1b9   :  { %v591_v47 = vadd.f32 %v590_v34, %v568_v58 }
 0x1bb   :  { %v1617_v57 = vpack.c.bf16 %v592_v54, %v591_v47 }
 0x1bd   :  { %1619 = vmatprep.subr.msk.bf16.mxu1 %vm1618_vm9, %v1617_v57 }
 0x1be   :  { %1622 = vmatpush3.bf16.xpose.msk.msra.mxu1 %vm1618_vm9, %v1617_v57 }
 0x1e4   :  { %v1609_v28 = vpop.f32.mrb[2].mxu0 }
 0x1e5   :  { %v602_v50 = vadd.f32 %v1609_v28, %v599_v37  ;;  %v578_v36 = vpop.f32.mrb[3].mxu0 }
 0x1e6   :  { %v601_v61 = vadd.f32 %v599_v37, %v578_v36 }
 0x1e7   :  { %607 = vrot.lane.b32.xlu0 %v602_v50, %s1832_s27 }
 0x1e8   :  { %605 = vrot.lane.b32.xlu1 %v601_v61, %s1832_s27 }
 0x259   :  { %v608_v9 = vpop.permute.xlu0 %607 }
 0x25a   :  { %v606_v2 = vpop.permute.xlu1 %605 }
 0x25b   :  { %1614 = vmatprep.mubr.msk.f32.mxu1 %vm485_vm2, %v606_v2 }
 0x25c   :  { %1615 = vmatmul.mubr.msk.f32.vlgmr.msra.gmra.mrb[0].mxu1 %vm485_vm2, %v608_v9  ;;  %vm711_vm2 = vcmask 162816  }
 0x32f   :  { %v1616_v5 = vpop.f32.mrb[0].mxu1 }
 0x330   :  { %698 = vrot.lane.b32.xlu0 %v1616_v5, %s1833_s28  ;;  %v685_v49 = vpop.f32.mrb[1].mxu1 }
 0x331   :  { %696 = vrot.lane.b32.xlu1 %v685_v49, %s1833_s28 }
 0x334   :  { %704 = vrot.lane.b32.xlu0 %v1616_v5, %s1834_s29 }
 0x335   :  { %702 = vrot.lane.b32.xlu1 %v685_v49, %s1834_s29 }
 0x3a2   :  { %v699_v12 = vpop.permute.xlu0 %698 }
 0x3a3   :  { %v697_v20 = vpop.permute.xlu1 %696  ;;  %v710_v1 = vsel %vm708_vm14, %v1616_v5, %v699_v12 }
 0x3a4   :  { %v709_v14 = vsel %vm708_vm14, %v685_v49, %v697_v20 }
 0x3a6   :  { %v705_v22 = vpop.permute.xlu0 %704 }
 0x3a7   :  { %v713_v29 = vsel %vm711_vm2, %v710_v1, %v705_v22  ;;  %v703_v21 = vpop.permute.xlu1 %702 }
 0x3a8   :  { %v721_v16 = vsel %vm719_vm10, -1e+09, %v713_v29  ;;  %v712_v24 = vsel %vm711_vm2, %v709_v14, %v703_v21 }
 0x3a9   :  { %v759_v27 = vsel %vm722_vm11, %v721_v16, -inf  ;;  %v720_v59 = vsel %vm718_vm12, -1e+09, %v712_v24 }
 0x3aa   :  { %v760_v60 = vrot.slane %v759_v27, 4  ;;  %v723_v30 = vsel %vm722_vm11, %v720_v59, -inf }
 0x3ab   :  { %v724_v56 = vrot.slane %v723_v30, 4 }
 0x3ac   :  { %v761_v44 = vmax.f32 %v759_v27, %v760_v60 }
 0x3ad   :  { %v725_v43 = vmax.f32 %v723_v30, %v724_v56 }
 0x3ae   :  { %v762_v31 = vrot.slane %v761_v44, 2 }
 0x3af   :  { %v726_v33 = vrot.slane %v725_v43, 2 }
 0x3b0   :  { %v763_v35 = vmax.f32 %v761_v44, %v762_v31 }
 0x3b1   :  { %v727_v25 = vmax.f32 %v725_v43, %v726_v33 }
 0x3b2   :  { %v764_v13 = vrot.slane %v763_v35, 1 }
 0x3b3   :  { %v728_v62 = vrot.slane %v727_v25, 1 }
 0x3b4   :  { %v765_v11 = vmax.f32 %v763_v35, %v764_v13 }
 0x3b5   :  { %v729_v38 = vmax.f32 %v727_v25, %v728_v62 }
 0x3b6   :  { %v766_v23 = vsub.f32 %v721_v16, %v765_v11 }
 0x3b7   :  { %v730_v63 = vsub.f32 %v720_v59, %v729_v38 }
 0x3b8   :  { %v767_v18 = vmul.f32 1.442695, %v766_v23 }
 0x3b9   :  { %v731_v42 = vmul.f32 1.442695, %v730_v63 }
 0x3ba   :  { %1794 = vpow2.f32 %v767_v18 }
 0x3bb   :  { %1796 = vpow2.f32 %v731_v42 }
 0x3c4   :  { %v1795_v17 = vpop.eup %1794 }
 0x3c5   :  { %v1797_v51 = vpop.eup %1796  ;;  %v769_v45 = vsel %vm722_vm11, %v1795_v17, 0.0  ;;  %v777_v46 = vmul.f32 %v1795_v17, %v715_v4  ;;  %v786_v32 = vmul.f32 %v1795_v17, %v717_v15  ;;  %v1835_v4 = vmov 10  }
 0x3c6   :  { %v770_v26 = vrot.slane %v769_v45, 4  ;;  %v733_v6 = vsel %vm722_vm11, %v1797_v51, 0.0  ;;  %v741_v53 = vmul.f32 %v1797_v51, %v714_v40  ;;  %v750_v19 = vmul.f32 %v1797_v51, %v716_v48 }
 0x3c7   :  { %v778_v55 = vsel %vm722_vm11, %v777_v46, 0.0  ;;  %v787_v52 = vsel %vm722_vm11, %v786_v32, 0.0  ;;  %v734_v34 = vrot.slane %v733_v6, 4  ;;  %v1836_v40 = vmov 1   ;;  %v19_v46 = vld [vmem:[%s2594_s3 + $0x10] sm:$0xff] }
 0x3c8   :  { %v771_v3 = vadd.f32 %v770_v26, %v769_v45  ;;  %v779_v54 = vrot.slane %v778_v55, 4  ;;  %v788_v58 = vrot.slane %v787_v52, 4  ;;  %v742_v47 = vsel %vm722_vm11, %v741_v53, 0.0 }
 0x3c9   :  { %v735_v57 = vadd.f32 %v734_v34, %v733_v6  ;;  %v743_v37 = vrot.slane %v742_v47, 4  ;;  %v751_v28 = vsel %vm722_vm11, %v750_v19, 0.0  ;;  %v1837_v17 = vmov 20   ;;  %v1822_v6 = vld [vmem:[%s2594_s3] sm:$0xff] }
 0x3ca   :  { %v772_v50 = vrot.slane %v771_v3, 2  ;;  %v752_v36 = vrot.slane %v751_v28, 4  ;;  %v780_v61 = vadd.f32 %v779_v54, %v778_v55  ;;  %v789_v2 = vadd.f32 %v788_v58, %v787_v52 }
 0x3cb   :  { %v736_v9 = vrot.slane %v735_v57, 2  ;;  %v744_v49 = vadd.f32 %v743_v37, %v742_v47  ;;  %v1838_v51 = vmov 11   ;;  %v1839_v45 = vmov 21  }
 0x3cc   :  { %v773_v5 = vadd.f32 %v772_v50, %v771_v3  ;;  %v753_v12 = vadd.f32 %v752_v36, %v751_v28  ;;  %v781_v48 = vrot.slane %v780_v61, 2  ;;  %v790_v1 = vrot.slane %v789_v2, 2 }
 0x3cd   :  { %v737_v15 = vadd.f32 %v736_v9, %v735_v57  ;;  %v745_v29 = vrot.slane %v744_v49, 2  ;;  %v2311_v32 = vsub.s32 4, %v1907_v7  ;;  %v2314_v26 = vrot.slane %v19_v46, %v1910_v8 }
 0x3ce   :  { %v774_v20 = vrot.slane %v773_v5, 1  ;;  %v754_v21 = vrot.slane %v753_v12, 2  ;;  %v782_v24 = vadd.f32 %v781_v48, %v780_v61  ;;  %v791_v27 = vadd.f32 %v790_v1, %v789_v2  ;;  %v20_v2 = vld [vmem:[%s2594_s3 + $0x18] sm:$0xff] }
 0x3cf   :  { %v738_v22 = vrot.slane %v737_v15, 1  ;;  %v746_v59 = vadd.f32 %v745_v29, %v744_v49  ;;  %v2320_v53 = vrot.slane %v1822_v6, %v2311_v32  ;;  %v2323_v19 = vrot.slane %v19_v46, %v2185_v39 }
 0x3d0   :  { %v775_v14 = vadd.f32 %v774_v20, %v773_v5  ;;  %v755_v60 = vadd.f32 %v754_v21, %v753_v12  ;;  %v783_v30 = vrot.slane %v782_v24, 1  ;;  %v792_v56 = vrot.slane %v791_v27, 1 }
 0x3d1   :  { %v739_v16 = vadd.f32 %v738_v22, %v737_v15  ;;  %v747_v44 = vrot.slane %v746_v59, 1  ;;  %v2327_v3 = vrot.slane %v19_v46, %v1918_v10  ;;  %v2332_v47 = vrot.slane %v19_v46, %v2311_v32 }
 0x3d2   :  { %1798 = vrcp.f32 %v775_v14  ;;  %v756_v43 = vrot.slane %v755_v60, 1  ;;  %v784_v31 = vadd.f32 %v783_v30, %v782_v24  ;;  %v793_v33 = vadd.f32 %v792_v56, %v791_v27 }
 0x3d3   :  { %1800 = vrcp.f32 %v739_v16  ;;  %v748_v25 = vadd.f32 %v747_v44, %v746_v59  ;;  %v820_v36 = vsub.s32 5, %v1907_v7  ;;  %v2337_v61 = vrot.slane %v19_v46, %v2259_v41 }
 0x3d4   :  { %v757_v13 = vadd.f32 %v756_v43, %v755_v60  ;;  %v2348_v15 = vrot.slane %v20_v2, %v1910_v8  ;;  %v2352_v1 = vrot.slane %v20_v2, %v1918_v10  ;;  %v2355_v14 = vrot.slane %v20_v2, %v2259_v41 }
 0x3d5   :  { %v2345_v12 = vrot.slane %v19_v46, %v820_v36  ;;  %v2360_v24 = vrot.slane %v20_v2, %v2185_v39  ;;  %v2364_v60 = vrot.slane %v20_v2, %v2311_v32 }
 0x3d6   :  { %v884_v21 = vmul.f32 0.0, %v2348_v15  ;;  %v886_v27 = vmul.f32 0.0, %v2352_v1  ;;  %v888_v30 = vmul.f32 0.0, %v2355_v14 }
 0x3d7   :  { %v890_v44 = vmul.f32 0.0, %v2360_v24 }
 0x3dc   :  { %v1799_v35 = vpop.eup %1798 }
 0x3dd   :  { %v1801_v62 = vpop.eup %1800  ;;  %v785_v11 = vmul.f32 %v1799_v35, %v784_v31  ;;  %v794_v38 = vmul.f32 %v1799_v35, %v793_v33  ;;  %v892_v31 = vmul.f32 0.0, %v2364_v60 }
 0x3de   :  { %v749_v23 = vmul.f32 %v1801_v62, %v748_v25  ;;  %v758_v63 = vmul.f32 %v1801_v62, %v757_v13  ;;  %v1840_v62 = vmov 2  }
 0x3e0   :  { %v2287_v18 = vsel %vm795_vm13, %v749_v23, %v785_v11  ;;  %v2289_v42 = vsel %vm795_vm13, %v758_v63, %v794_v38  ;;  %v1841_v11 = vmov 3   ;;  %v1842_v38 = vmov 4  }
 0x3e1   :  { %855 = vperm.xlu0 %1679, %v2289_v42   ;;  %848 = vperm.xlu1 %1680, %v2287_v18   ;;  %v1843_v23 = vmov 22   ;;  %v1844_v63 = vmov 12  }
 0x3e5   :  { %1682 = vset.pattern.permute.xlu0 %v1835_v4  ;;  %1681 = vset.pattern.permute.xlu1 %v1835_v4 }
 0x3e6   :  { %867 = vperm.xlu0 %1682, %v2289_v42   ;;  %861 = vperm.xlu1 %1681, %v2287_v18  }
 0x3ea   :  { %1684 = vset.pattern.permute.xlu0 %v1836_v40  ;;  %1683 = vset.pattern.permute.xlu1 %v1837_v17 }
 0x3eb   :  { %896 = vperm.xlu0 %1684, %v2287_v18   ;;  %873 = vperm.xlu1 %1683, %v2287_v18  }
 0x3ef   :  { %1687 = vset.pattern.permute.xlu0 %v1838_v51  ;;  %879 = vperm.xlu1 %1683, %v2289_v42  }
 0x3f0   :  { %914 = vperm.xlu0 %1687, %v2289_v42  }
 0x3f3   :  { %1685 = vset.pattern.permute.xlu1 %v1836_v40 }
 0x3f4   :  { %902 = vperm.xlu1 %1685, %v2289_v42   ;;  %1689 = vset.pattern.permute.xlu0 %v1824_v0 }
 0x3f8   :  { %1686 = vset.pattern.permute.xlu1 %v1838_v51 }
 0x3f9   :  { %908 = vperm.xlu1 %1686, %v2287_v18  }
 0x3fd   :  { %1688 = vset.pattern.permute.xlu1 %v1839_v45 }
 0x3fe   :  { %920 = vperm.xlu1 %1688, %v2287_v18  }
 0x402   :  { %926 = vperm.xlu1 %1688, %v2289_v42  }
 0x406   :  { %1690 = vset.pattern.permute.xlu1 %v1836_v40 }
 0x460   :  { %v856_v55 = vpop.permute.xlu0 %855  ;;  %v849_v52 = vpop.permute.xlu1 %848 }
 0x461   :  { %v851_v34 = vmul.f32 %v849_v52, %v2314_v26  ;;  %v858_v54 = vmul.f32 %v856_v55, %v2323_v19 }
 0x463   :  { %v852_v58 = vadd.f32 %v851_v34, %v2320_v53 }
 0x465   :  { %v859_v57 = vadd.f32 %v858_v54, %v852_v58  ;;  %v862_v37 = vpop.permute.xlu1 %861  ;;  %v868_v28 = vpop.permute.xlu0 %867 }
 0x466   :  { %v864_v50 = vmul.f32 %v862_v37, %v2327_v3  ;;  %v870_v5 = vmul.f32 %v868_v28, %v2332_v47 }
 0x468   :  { %v865_v9 = vadd.f32 %v864_v50, %v859_v57 }
 0x46a   :  { %v874_v49 = vpop.permute.xlu1 %873  ;;  %v871_v20 = vadd.f32 %v870_v5, %v865_v9  ;;  %v897_v17 = vpop.permute.xlu0 %896 }
 0x46b   :  { %v876_v48 = vmul.f32 %v874_v49, %v2337_v61  ;;  %v899_v45 = vmul.f32 %v897_v17, %v2314_v26 }
 0x46d   :  { %v877_v29 = vadd.f32 %v876_v48, %v871_v20  ;;  %v900_v6 = vadd.f32 %v899_v45, %v2320_v53 }
 0x46e   :  { %v880_v22 = vpop.permute.xlu1 %879 }
 0x46f   :  { %v882_v16 = vmul.f32 %v880_v22, %v2345_v12  ;;  %v915_v54 = vpop.permute.xlu0 %914 }
 0x470   :  { %v917_v57 = vmul.f32 %v915_v54, %v2332_v47 }
 0x471   :  { %v883_v59 = vadd.f32 %v882_v16, %v877_v29 }
 0x473   :  { %v885_v56 = vadd.f32 %v884_v21, %v883_v59  ;;  %v903_v4 = vpop.permute.xlu1 %902 }
 0x474   :  { %v905_v46 = vmul.f32 %v903_v4, %v2323_v19 }
 0x475   :  { %v887_v43 = vadd.f32 %v886_v27, %v885_v56 }
 0x476   :  { %v906_v34 = vadd.f32 %v905_v46, %v900_v6 }
 0x477   :  { %v889_v33 = vadd.f32 %v888_v30, %v887_v43 }
 0x478   :  { %v909_v51 = vpop.permute.xlu1 %908 }
 0x479   :  { %v891_v35 = vadd.f32 %v890_v44, %v889_v33  ;;  %v911_v55 = vmul.f32 %v909_v51, %v2327_v3 }
 0x47b   :  { %v893_v25 = vadd.f32 %v892_v31, %v891_v35  ;;  %v912_v58 = vadd.f32 %v911_v55, %v906_v34 }
 0x47d   :  { %1802 = vtanh.f32 %v893_v25  ;;  %v921_v52 = vpop.permute.xlu1 %920  ;;  %v918_v28 = vadd.f32 %v917_v57, %v912_v58  ;;  %v1845_v25 = vmov 13  }
 0x47e   :  { %v923_v50 = vmul.f32 %v921_v52, %v2337_v61 }
 0x480   :  { %v924_v9 = vadd.f32 %v923_v50, %v918_v28 }
 0x481   :  { %v927_v37 = vpop.permute.xlu1 %926 }
 0x482   :  { %v929_v2 = vmul.f32 %v927_v37, %v2345_v12 }
 0x484   :  { %v930_v20 = vadd.f32 %v929_v2, %v924_v9 }
 0x487   :  { %v1803_v13 = vpop.eup %1802 }
 0x488   :  { %939 = vperm.xlu1 %1690, %v1803_v13   ;;  %933 = vperm.xlu0 %1689, %v1803_v13  }
 0x48c   :  { %1691 = vset.pattern.permute.xlu1 %v1840_v62  ;;  %1692 = vset.pattern.permute.xlu0 %v1841_v11 }
 0x48d   :  { %945 = vperm.xlu1 %1691, %v1803_v13   ;;  %951 = vperm.xlu0 %1692, %v1803_v13  }
 0x491   :  { %1693 = vset.pattern.permute.xlu1 %v1842_v38  ;;  %1695 = vset.pattern.permute.xlu0 %v1840_v62 }
 0x492   :  { %957 = vperm.xlu1 %1693, %v1803_v13   ;;  %970 = vperm.xlu0 %1695, %v2289_v42   ;;  %v1846_v13 = vmov 23  }
 0x496   :  { %1694 = vset.pattern.permute.xlu1 %v1840_v62  ;;  %1697 = vset.pattern.permute.xlu0 %v1843_v23 }
 0x497   :  { %964 = vperm.xlu1 %1694, %v2287_v18   ;;  %988 = vperm.xlu0 %1697, %v2287_v18  }
 0x49b   :  { %1696 = vset.pattern.permute.xlu1 %v1844_v63  ;;  %1700 = vset.pattern.permute.xlu0 %v1836_v40 }
 0x49c   :  { %976 = vperm.xlu1 %1696, %v2287_v18  }
 0x4a0   :  { %982 = vperm.xlu1 %1696, %v2289_v42  }
 0x4a4   :  { %1698 = vset.pattern.permute.xlu1 %v1843_v23 }
 0x4a5   :  { %994 = vperm.xlu1 %1698, %v2289_v42  }
 0x4a9   :  { %1699 = vset.pattern.permute.xlu1 %v1824_v0 }
 0x507   :  { %v934_v5 = vpop.permute.xlu0 %933  ;;  %v940_v49 = vpop.permute.xlu1 %939 }
 0x508   :  { %v936_v48 = vmul.f32 %v934_v5, %v2348_v15  ;;  %v942_v29 = vmul.f32 %v940_v49, %v2352_v1 }
 0x50a   :  { %v937_v22 = vadd.f32 %v936_v48, %v930_v20 }
 0x50c   :  { %v943_v21 = vadd.f32 %v942_v29, %v937_v22  ;;  %v952_v16 = vpop.permute.xlu0 %951  ;;  %v946_v27 = vpop.permute.xlu1 %945 }
 0x50d   :  { %v948_v59 = vmul.f32 %v946_v27, %v2355_v14  ;;  %v954_v30 = vmul.f32 %v952_v16, %v2360_v24 }
 0x50f   :  { %v949_v56 = vadd.f32 %v948_v59, %v943_v21 }
 0x511   :  { %v955_v44 = vadd.f32 %v954_v30, %v949_v56  ;;  %v958_v43 = vpop.permute.xlu1 %957  ;;  %v971_v17 = vpop.permute.xlu0 %970 }
 0x512   :  { %v960_v31 = vmul.f32 %v958_v43, %v2364_v60  ;;  %v973_v45 = vmul.f32 %v971_v17, %v2323_v19 }
 0x514   :  { %v961_v33 = vadd.f32 %v960_v31, %v955_v44 }
 0x516   :  { %1804 = vtanh.f32 %v961_v33  ;;  %v965_v23 = vpop.permute.xlu1 %964  ;;  %v989_v54 = vpop.permute.xlu0 %988  ;;  %v1847_v33 = vmov 14  }
 0x517   :  { %v967_v63 = vmul.f32 %v965_v23, %v2314_v26  ;;  %v991_v37 = vmul.f32 %v989_v54, %v2337_v61 }
 0x519   :  { %v968_v51 = vadd.f32 %v967_v63, %v2320_v53 }
 0x51b   :  { %v977_v4 = vpop.permute.xlu1 %976  ;;  %v974_v6 = vadd.f32 %v973_v45, %v968_v51 }
 0x51c   :  { %v979_v55 = vmul.f32 %v977_v4, %v2327_v3 }
 0x51e   :  { %v980_v34 = vadd.f32 %v979_v55, %v974_v6 }
 0x51f   :  { %v983_v46 = vpop.permute.xlu1 %982 }
 0x520   :  { %v1805_v35 = vpop.eup %1804  ;;  %v985_v52 = vmul.f32 %v983_v46, %v2332_v47 }
 0x521   :  { %1007 = vperm.xlu0 %1700, %v1805_v35   ;;  %1001 = vperm.xlu1 %1699, %v1805_v35  }
 0x522   :  { %v986_v58 = vadd.f32 %v985_v52, %v980_v34 }
 0x524   :  { %v995_v57 = vpop.permute.xlu1 %994  ;;  %v992_v28 = vadd.f32 %v991_v37, %v986_v58 }
 0x525   :  { %1703 = vset.pattern.permute.xlu0 %v1842_v38  ;;  %1701 = vset.pattern.permute.xlu1 %v1840_v62  ;;  %v997_v50 = vmul.f32 %v995_v57, %v2345_v12 }
 0x526   :  { %1025 = vperm.xlu0 %1703, %v1805_v35   ;;  %1013 = vperm.xlu1 %1701, %v1805_v35  }
 0x527   :  { %v998_v9 = vadd.f32 %v997_v50, %v992_v28 }
 0x52a   :  { %1704 = vset.pattern.permute.xlu0 %v1845_v25  ;;  %1702 = vset.pattern.permute.xlu1 %v1841_v11 }
 0x52b   :  { %1044 = vperm.xlu0 %1704, %v2287_v18   ;;  %1019 = vperm.xlu1 %1702, %v1805_v35   ;;  %v1848_v35 = vmov 24  }
 0x52f   :  { %1707 = vset.pattern.permute.xlu0 %v1846_v13  ;;  %1032 = vperm.xlu1 %1702, %v2287_v18  }
 0x530   :  { %1062 = vperm.xlu0 %1707, %v2289_v42  }
 0x533   :  { %1038 = vperm.xlu1 %1702, %v2289_v42  }
 0x534   :  { %1710 = vset.pattern.permute.xlu0 %v1840_v62 }
 0x537   :  { %1705 = vset.pattern.permute.xlu1 %v1845_v25 }
 0x538   :  { %1050 = vperm.xlu1 %1705, %v2289_v42  }
 0x53c   :  { %1706 = vset.pattern.permute.xlu1 %v1846_v13 }
 0x53d   :  { %1056 = vperm.xlu1 %1706, %v2287_v18  }
 0x541   :  { %1708 = vset.pattern.permute.xlu1 %v1824_v0 }
 0x5a0   :  { %v1002_v2 = vpop.permute.xlu1 %1001  ;;  %v1008_v49 = vpop.permute.xlu0 %1007 }
 0x5a1   :  { %v1004_v5 = vmul.f32 %v1002_v2, %v2348_v15  ;;  %v1010_v48 = vmul.f32 %v1008_v49, %v2352_v1 }
 0x5a3   :  { %v1005_v20 = vadd.f32 %v1004_v5, %v998_v9 }
 0x5a5   :  { %v1014_v22 = vpop.permute.xlu1 %1013  ;;  %v1011_v29 = vadd.f32 %v1010_v48, %v1005_v20  ;;  %v1026_v16 = vpop.permute.xlu0 %1025 }
 0x5a6   :  { %v1016_v21 = vmul.f32 %v1014_v22, %v2355_v14  ;;  %v1028_v56 = vmul.f32 %v1026_v16, %v2364_v60 }
 0x5a8   :  { %v1017_v59 = vadd.f32 %v1016_v21, %v1011_v29 }
 0x5aa   :  { %v1020_v27 = vpop.permute.xlu1 %1019  ;;  %v1045_v51 = vpop.permute.xlu0 %1044 }
 0x5ab   :  { %v1022_v30 = vmul.f32 %v1020_v27, %v2360_v24  ;;  %v1047_v46 = vmul.f32 %v1045_v51, %v2327_v3 }
 0x5ad   :  { %v1023_v44 = vadd.f32 %v1022_v30, %v1017_v59 }
 0x5ae   :  { %v1033_v25 = vpop.permute.xlu1 %1032 }
 0x5af   :  { %v1029_v43 = vadd.f32 %v1028_v56, %v1023_v44  ;;  %v1035_v23 = vmul.f32 %v1033_v25, %v2314_v26  ;;  %v1063_v58 = vpop.permute.xlu0 %1062 }
 0x5b0   :  { %v1065_v28 = vmul.f32 %v1063_v58, %v2345_v12 }
 0x5b1   :  { %1806 = vtanh.f32 %v1029_v43  ;;  %v1036_v17 = vadd.f32 %v1035_v23, %v2320_v53  ;;  %v1849_v43 = vmov 5  }
 0x5b2   :  { %v1039_v13 = vpop.permute.xlu1 %1038 }
 0x5b3   :  { %v1041_v63 = vmul.f32 %v1039_v13, %v2323_v19 }
 0x5b5   :  { %v1042_v45 = vadd.f32 %v1041_v63, %v1036_v17 }
 0x5b7   :  { %v1051_v4 = vpop.permute.xlu1 %1050  ;;  %v1048_v55 = vadd.f32 %v1047_v46, %v1042_v45 }
 0x5b8   :  { %v1053_v52 = vmul.f32 %v1051_v4, %v2332_v47 }
 0x5ba   :  { %v1054_v54 = vadd.f32 %v1053_v52, %v1048_v55 }
 0x5bb   :  { %v1807_v31 = vpop.eup %1806 }
 0x5bc   :  { %1081 = vperm.xlu0 %1710, %v1807_v31   ;;  %1069 = vperm.xlu1 %1708, %v1807_v31   ;;  %v1057_v6 = vpop.permute.xlu1 %1056 }
 0x5bd   :  { %v1059_v34 = vmul.f32 %v1057_v6, %v2337_v61 }
 0x5bf   :  { %v1060_v57 = vadd.f32 %v1059_v34, %v1054_v54 }
 0x5c0   :  { %1713 = vset.pattern.permute.xlu0 %v1842_v38  ;;  %1709 = vset.pattern.permute.xlu1 %v1836_v40 }
 0x5c1   :  { %1100 = vperm.xlu0 %1713, %v2287_v18   ;;  %1075 = vperm.xlu1 %1709, %v1807_v31   ;;  %v1066_v2 = vadd.f32 %v1065_v28, %v1060_v57 }
 0x5c5   :  { %1715 = vset.pattern.permute.xlu0 %v1847_v33  ;;  %1711 = vset.pattern.permute.xlu1 %v1841_v11 }
 0x5c6   :  { %1118 = vperm.xlu0 %1715, %v2289_v42   ;;  %1087 = vperm.xlu1 %1711, %v1807_v31  }
 0x5ca   :  { %1712 = vset.pattern.permute.xlu1 %v1842_v38  ;;  %1717 = vset.pattern.permute.xlu0 %v1824_v0 }
 0x5cb   :  { %1093 = vperm.xlu1 %1712, %v1807_v31   ;;  %v1850_v31 = vmov 25  }
 0x5cf   :  { %1106 = vperm.xlu1 %1712, %v2289_v42  }
 0x5d3   :  { %1714 = vset.pattern.permute.xlu1 %v1847_v33  ;;  %v1851_v33 = vmov 15  }
 0x5d4   :  { %1112 = vperm.xlu1 %1714, %v2287_v18  }
 0x5d8   :  { %1716 = vset.pattern.permute.xlu1 %v1848_v35 }
 0x5d9   :  { %1124 = vperm.xlu1 %1716, %v2287_v18  }
 0x5dd   :  { %1130 = vperm.xlu1 %1716, %v2289_v42  }
 0x5e1   :  { %1718 = vset.pattern.permute.xlu1 %v1836_v40 }
 0x63b   :  { %v1070_v37 = vpop.permute.xlu1 %1069  ;;  %v1082_v20 = vpop.permute.xlu0 %1081 }
 0x63c   :  { %v1072_v50 = vmul.f32 %v1070_v37, %v2348_v15  ;;  %v1084_v22 = vmul.f32 %v1082_v20, %v2355_v14 }
 0x63e   :  { %v1073_v5 = vadd.f32 %v1072_v50, %v1066_v2 }
 0x640   :  { %v1076_v9 = vpop.permute.xlu1 %1075  ;;  %v1101_v25 = vpop.permute.xlu0 %1100 }
 0x641   :  { %v1078_v49 = vmul.f32 %v1076_v9, %v2352_v1  ;;  %v1103_v23 = vmul.f32 %v1101_v25, %v2314_v26 }
 0x643   :  { %v1079_v48 = vadd.f32 %v1078_v49, %v1073_v5  ;;  %v1104_v4 = vadd.f32 %v1103_v23, %v2320_v53 }
 0x645   :  { %v1088_v29 = vpop.permute.xlu1 %1087  ;;  %v1085_v21 = vadd.f32 %v1084_v22, %v1079_v48  ;;  %v1119_v46 = vpop.permute.xlu0 %1118 }
 0x646   :  { %v1090_v16 = vmul.f32 %v1088_v29, %v2360_v24  ;;  %v1121_v55 = vmul.f32 %v1119_v46, %v2332_v47 }
 0x648   :  { %v1091_v59 = vadd.f32 %v1090_v16, %v1085_v21 }
 0x64a   :  { %v1094_v27 = vpop.permute.xlu1 %1093 }
 0x64b   :  { %v1096_v30 = vmul.f32 %v1094_v27, %v2364_v60 }
 0x64d   :  { %v1097_v56 = vadd.f32 %v1096_v30, %v1091_v59 }
 0x64e   :  { %v1107_v35 = vpop.permute.xlu1 %1106 }
 0x64f   :  { %1808 = vtanh.f32 %v1097_v56  ;;  %v1109_v63 = vmul.f32 %v1107_v35, %v2323_v19 }
 0x651   :  { %v1110_v45 = vadd.f32 %v1109_v63, %v1104_v4 }
 0x653   :  { %v1113_v13 = vpop.permute.xlu1 %1112 }
 0x654   :  { %v1115_v17 = vmul.f32 %v1113_v13, %v2327_v3 }
 0x656   :  { %v1116_v6 = vadd.f32 %v1115_v17, %v1110_v45 }
 0x658   :  { %v1125_v51 = vpop.permute.xlu1 %1124  ;;  %v1122_v34 = vadd.f32 %v1121_v55, %v1116_v6 }
 0x659   :  { %v1809_v44 = vpop.eup %1808  ;;  %v1127_v54 = vmul.f32 %v1125_v51, %v2337_v61 }
 0x65a   :  { %1143 = vperm.xlu1 %1718, %v1809_v44   ;;  %1137 = vperm.xlu0 %1717, %v1809_v44  }
 0x65b   :  { %v1128_v57 = vadd.f32 %v1127_v54, %v1122_v34 }
 0x65c   :  { %v1131_v52 = vpop.permute.xlu1 %1130 }
 0x65d   :  { %v1133_v58 = vmul.f32 %v1131_v52, %v2345_v12 }
 0x65e   :  { %1719 = vset.pattern.permute.xlu1 %v1840_v62  ;;  %1720 = vset.pattern.permute.xlu0 %v1841_v11 }
 0x65f   :  { %1149 = vperm.xlu1 %1719, %v1809_v44   ;;  %1155 = vperm.xlu0 %1720, %v1809_v44   ;;  %v1134_v50 = vadd.f32 %v1133_v58, %v1128_v57 }
 0x663   :  { %1721 = vset.pattern.permute.xlu1 %v1842_v38  ;;  %1723 = vset.pattern.permute.xlu0 %v1849_v43 }
 0x664   :  { %1161 = vperm.xlu1 %1721, %v1809_v44   ;;  %1174 = vperm.xlu0 %1723, %v2289_v42   ;;  %v1852_v44 = vmov 16  }
 0x668   :  { %1722 = vset.pattern.permute.xlu1 %v1849_v43  ;;  %1725 = vset.pattern.permute.xlu0 %v1850_v31  ;;  %v1853_v43 = vmov 26  }
 0x669   :  { %1168 = vperm.xlu1 %1722, %v2287_v18   ;;  %1192 = vperm.xlu0 %1725, %v2287_v18  }
 0x66d   :  { %1724 = vset.pattern.permute.xlu1 %v1851_v33  ;;  %1728 = vset.pattern.permute.xlu0 %v1836_v40 }
 0x66e   :  { %1180 = vperm.xlu1 %1724, %v2287_v18  }
 0x672   :  { %1186 = vperm.xlu1 %1724, %v2289_v42  }
 0x676   :  { %1726 = vset.pattern.permute.xlu1 %v1850_v31  ;;  %v1854_v31 = vmov 6  }
 0x677   :  { %1198 = vperm.xlu1 %1726, %v2289_v42  }
 0x67b   :  { %1727 = vset.pattern.permute.xlu1 %v1824_v0 }
 0x6d9   :  { %v1138_v37 = vpop.permute.xlu0 %1137  ;;  %v1144_v28 = vpop.permute.xlu1 %1143 }
 0x6da   :  { %v1140_v2 = vmul.f32 %v1138_v37, %v2348_v15  ;;  %v1146_v5 = vmul.f32 %v1144_v28, %v2352_v1 }
 0x6dc   :  { %v1141_v9 = vadd.f32 %v1140_v2, %v1134_v50 }
 0x6de   :  { %v1147_v49 = vadd.f32 %v1146_v5, %v1141_v9  ;;  %v1156_v20 = vpop.permute.xlu0 %1155  ;;  %v1150_v48 = vpop.permute.xlu1 %1149 }
 0x6df   :  { %v1152_v22 = vmul.f32 %v1150_v48, %v2355_v14  ;;  %v1158_v29 = vmul.f32 %v1156_v20, %v2360_v24 }
 0x6e1   :  { %v1153_v21 = vadd.f32 %v1152_v22, %v1147_v49 }
 0x6e3   :  { %v1159_v16 = vadd.f32 %v1158_v29, %v1153_v21  ;;  %v1162_v27 = vpop.permute.xlu1 %1161  ;;  %v1175_v13 = vpop.permute.xlu0 %1174 }
 0x6e4   :  { %v1164_v59 = vmul.f32 %v1162_v27, %v2364_v60  ;;  %v1177_v63 = vmul.f32 %v1175_v13, %v2323_v19 }
 0x6e6   :  { %v1165_v30 = vadd.f32 %v1164_v59, %v1159_v16 }
 0x6e8   :  { %1810 = vtanh.f32 %v1165_v30  ;;  %v1169_v33 = vpop.permute.xlu1 %1168  ;;  %v1193_v6 = vpop.permute.xlu0 %1192 }
 0x6e9   :  { %v1171_v35 = vmul.f32 %v1169_v33, %v2314_v26  ;;  %v1195_v34 = vmul.f32 %v1193_v6, %v2337_v61 }
 0x6eb   :  { %v1172_v23 = vadd.f32 %v1171_v35, %v2320_v53 }
 0x6ed   :  { %v1181_v25 = vpop.permute.xlu1 %1180  ;;  %v1178_v17 = vadd.f32 %v1177_v63, %v1172_v23 }
 0x6ee   :  { %v1183_v51 = vmul.f32 %v1181_v25, %v2327_v3 }
 0x6f0   :  { %v1184_v46 = vadd.f32 %v1183_v51, %v1178_v17 }
 0x6f1   :  { %v1187_v4 = vpop.permute.xlu1 %1186 }
 0x6f2   :  { %v1811_v56 = vpop.eup %1810  ;;  %v1189_v45 = vmul.f32 %v1187_v4, %v2332_v47 }
 0x6f3   :  { %1211 = vperm.xlu0 %1728, %v1811_v56   ;;  %1205 = vperm.xlu1 %1727, %v1811_v56  }
 0x6f4   :  { %v1190_v55 = vadd.f32 %v1189_v45, %v1184_v46 }
 0x6f6   :  { %v1199_v52 = vpop.permute.xlu1 %1198  ;;  %v1196_v54 = vadd.f32 %v1195_v34, %v1190_v55 }
 0x6f7   :  { %1731 = vset.pattern.permute.xlu0 %v1842_v38  ;;  %1729 = vset.pattern.permute.xlu1 %v1840_v62  ;;  %v1201_v58 = vmul.f32 %v1199_v52, %v2345_v12 }
 0x6f8   :  { %1229 = vperm.xlu0 %1731, %v1811_v56   ;;  %1217 = vperm.xlu1 %1729, %v1811_v56  }
 0x6f9   :  { %v1202_v37 = vadd.f32 %v1201_v58, %v1196_v54 }
 0x6fc   :  { %1733 = vset.pattern.permute.xlu0 %v1852_v44  ;;  %1730 = vset.pattern.permute.xlu1 %v1841_v11 }
 0x6fd   :  { %1248 = vperm.xlu0 %1733, %v2287_v18   ;;  %1223 = vperm.xlu1 %1730, %v1811_v56   ;;  %v1855_v56 = vmov 7  }
 0x701   :  { %1736 = vset.pattern.permute.xlu0 %v1853_v43  ;;  %1732 = vset.pattern.permute.xlu1 %v1854_v31 }
 0x702   :  { %1266 = vperm.xlu0 %1736, %v2289_v42   ;;  %1236 = vperm.xlu1 %1732, %v2287_v18  }
 0x706   :  { %1242 = vperm.xlu1 %1732, %v2289_v42   ;;  %1739 = vset.pattern.permute.xlu0 %v1840_v62 }
 0x70a   :  { %1734 = vset.pattern.permute.xlu1 %v1852_v44  ;;  %v1856_v44 = vmov 17  }
 0x70b   :  { %1254 = vperm.xlu1 %1734, %v2289_v42  }
 0x70f   :  { %1735 = vset.pattern.permute.xlu1 %v1853_v43  ;;  %v1857_v43 = vmov 27  }
 0x710   :  { %1260 = vperm.xlu1 %1735, %v2287_v18  }
 0x714   :  { %1737 = vset.pattern.permute.xlu1 %v1824_v0 }
 0x772   :  { %v1206_v57 = vpop.permute.xlu1 %1205  ;;  %v1212_v50 = vpop.permute.xlu0 %1211 }
 0x773   :  { %v1208_v28 = vmul.f32 %v1206_v57, %v2348_v15  ;;  %v1214_v9 = vmul.f32 %v1212_v50, %v2352_v1 }
 0x775   :  { %v1209_v2 = vadd.f32 %v1208_v28, %v1202_v37 }
 0x777   :  { %v1218_v5 = vpop.permute.xlu1 %1217  ;;  %v1215_v49 = vadd.f32 %v1214_v9, %v1209_v2  ;;  %v1230_v48 = vpop.permute.xlu0 %1229 }
 0x778   :  { %v1220_v20 = vmul.f32 %v1218_v5, %v2355_v14  ;;  %v1232_v16 = vmul.f32 %v1230_v48, %v2364_v60 }
 0x77a   :  { %v1221_v29 = vadd.f32 %v1220_v20, %v1215_v49 }
 0x77c   :  { %v1224_v22 = vpop.permute.xlu1 %1223  ;;  %v1249_v63 = vpop.permute.xlu0 %1248 }
 0x77d   :  { %v1226_v21 = vmul.f32 %v1224_v22, %v2360_v24  ;;  %v1251_v17 = vmul.f32 %v1249_v63, %v2327_v3 }
 0x77f   :  { %v1227_v27 = vadd.f32 %v1226_v21, %v1221_v29 }
 0x781   :  { %v1233_v59 = vadd.f32 %v1232_v16, %v1227_v27  ;;  %v1237_v31 = vpop.permute.xlu1 %1236  ;;  %v1267_v52 = vpop.permute.xlu0 %1266 }
 0x782   :  { %v1239_v35 = vmul.f32 %v1237_v31, %v2314_v26  ;;  %v1269_v58 = vmul.f32 %v1267_v52, %v2345_v12 }
 0x783   :  { %1812 = vtanh.f32 %v1233_v59 }
 0x784   :  { %v1240_v23 = vadd.f32 %v1239_v35, %v2320_v53 }
 0x785   :  { %v1243_v33 = vpop.permute.xlu1 %1242 }
 0x786   :  { %v1245_v25 = vmul.f32 %v1243_v33, %v2323_v19 }
 0x788   :  { %v1246_v4 = vadd.f32 %v1245_v25, %v1240_v23 }
 0x78a   :  { %v1255_v13 = vpop.permute.xlu1 %1254  ;;  %v1252_v45 = vadd.f32 %v1251_v17, %v1246_v4 }
 0x78b   :  { %v1257_v46 = vmul.f32 %v1255_v13, %v2332_v47 }
 0x78d   :  { %v1813_v30 = vpop.eup %1812  ;;  %v1258_v55 = vadd.f32 %v1257_v46, %v1252_v45 }
 0x78e   :  { %1285 = vperm.xlu0 %1739, %v1813_v30   ;;  %1273 = vperm.xlu1 %1737, %v1813_v30  }
 0x78f   :  { %v1261_v51 = vpop.permute.xlu1 %1260 }
 0x790   :  { %v1263_v6 = vmul.f32 %v1261_v51, %v2337_v61 }
 0x792   :  { %1742 = vset.pattern.permute.xlu0 %v1855_v56  ;;  %1738 = vset.pattern.permute.xlu1 %v1836_v40  ;;  %v1264_v34 = vadd.f32 %v1263_v6, %v1258_v55 }
 0x793   :  { %1304 = vperm.xlu0 %1742, %v2287_v18   ;;  %1279 = vperm.xlu1 %1738, %v1813_v30  }
 0x794   :  { %v1270_v37 = vadd.f32 %v1269_v58, %v1264_v34 }
 0x797   :  { %1745 = vset.pattern.permute.xlu0 %v1856_v44  ;;  %1740 = vset.pattern.permute.xlu1 %v1841_v11 }
 0x798   :  { %1322 = vperm.xlu0 %1745, %v2289_v42   ;;  %1291 = vperm.xlu1 %1740, %v1813_v30  }
 0x79c   :  { %1741 = vset.pattern.permute.xlu1 %v1842_v38  ;;  %1747 = vset.pattern.permute.xlu0 %v1824_v0 }
 0x79d   :  { %1297 = vperm.xlu1 %1741, %v1813_v30   ;;  %v1858_v30 = vmov 8  }
 0x7a1   :  { %1743 = vset.pattern.permute.xlu1 %v1855_v56  ;;  %v1859_v56 = vmov 28  }
 0x7a2   :  { %1310 = vperm.xlu1 %1743, %v2289_v42  }
 0x7a6   :  { %1744 = vset.pattern.permute.xlu1 %v1856_v44  ;;  %v1860_v44 = vmov 18  }
 0x7a7   :  { %1316 = vperm.xlu1 %1744, %v2287_v18  }
 0x7ab   :  { %1746 = vset.pattern.permute.xlu1 %v1857_v43 }
 0x7ac   :  { %1328 = vperm.xlu1 %1746, %v2287_v18  }
 0x7b0   :  { %1334 = vperm.xlu1 %1746, %v2289_v42  }
 0x7b4   :  { %1748 = vset.pattern.permute.xlu1 %v1836_v40 }
 0x80d   :  { %v1274_v54 = vpop.permute.xlu1 %1273  ;;  %v1286_v9 = vpop.permute.xlu0 %1285 }
 0x80e   :  { %v1276_v57 = vmul.f32 %v1274_v54, %v2348_v15  ;;  %v1288_v49 = vmul.f32 %v1286_v9, %v2355_v14 }
 0x810   :  { %v1277_v50 = vadd.f32 %v1276_v57, %v1270_v37 }
 0x812   :  { %v1280_v28 = vpop.permute.xlu1 %1279  ;;  %v1305_v31 = vpop.permute.xlu0 %1304 }
 0x813   :  { %v1282_v2 = vmul.f32 %v1280_v28, %v2352_v1  ;;  %v1307_v35 = vmul.f32 %v1305_v31, %v2314_v26 }
 0x815   :  { %v1283_v5 = vadd.f32 %v1282_v2, %v1277_v50  ;;  %v1308_v13 = vadd.f32 %v1307_v35, %v2320_v53 }
 0x817   :  { %v1292_v20 = vpop.permute.xlu1 %1291  ;;  %v1289_v48 = vadd.f32 %v1288_v49, %v1283_v5  ;;  %v1323_v17 = vpop.permute.xlu0 %1322 }
 0x818   :  { %v1294_v22 = vmul.f32 %v1292_v20, %v2360_v24  ;;  %v1325_v45 = vmul.f32 %v1323_v17, %v2332_v47 }
 0x81a   :  { %v1295_v21 = vadd.f32 %v1294_v22, %v1289_v48 }
 0x81c   :  { %v1298_v29 = vpop.permute.xlu1 %1297 }
 0x81d   :  { %v1300_v16 = vmul.f32 %v1298_v29, %v2364_v60 }
 0x81f   :  { %v1301_v27 = vadd.f32 %v1300_v16, %v1295_v21 }
 0x821   :  { %1814 = vtanh.f32 %v1301_v27  ;;  %v1311_v43 = vpop.permute.xlu1 %1310 }
 0x822   :  { %v1313_v25 = vmul.f32 %v1311_v43, %v2323_v19 }
 0x824   :  { %v1314_v4 = vadd.f32 %v1313_v25, %v1308_v13 }
 0x826   :  { %v1317_v33 = vpop.permute.xlu1 %1316 }
 0x827   :  { %v1319_v23 = vmul.f32 %v1317_v33, %v2327_v3 }
 0x829   :  { %v1320_v51 = vadd.f32 %v1319_v23, %v1314_v4 }
 0x82b   :  { %v1815_v59 = vpop.eup %1814  ;;  %v1329_v63 = vpop.permute.xlu1 %1328  ;;  %v1326_v6 = vadd.f32 %v1325_v45, %v1320_v51 }
 0x82c   :  { %1347 = vperm.xlu1 %1748, %v1815_v59   ;;  %1341 = vperm.xlu0 %1747, %v1815_v59   ;;  %v1331_v55 = vmul.f32 %v1329_v63, %v2337_v61 }
 0x82e   :  { %v1332_v34 = vadd.f32 %v1331_v55, %v1326_v6 }
 0x82f   :  { %v1335_v46 = vpop.permute.xlu1 %1334 }
 0x830   :  { %1749 = vset.pattern.permute.xlu1 %v1840_v62  ;;  %1750 = vset.pattern.permute.xlu0 %v1841_v11  ;;  %v1337_v52 = vmul.f32 %v1335_v46, %v2345_v12 }
 0x831   :  { %1353 = vperm.xlu1 %1749, %v1815_v59   ;;  %1359 = vperm.xlu0 %1750, %v1815_v59  }
 0x832   :  { %v1338_v57 = vadd.f32 %v1337_v52, %v1332_v34 }
 0x835   :  { %1751 = vset.pattern.permute.xlu1 %v1842_v38  ;;  %1753 = vset.pattern.permute.xlu0 %v1858_v30 }
 0x836   :  { %1365 = vperm.xlu1 %1751, %v1815_v59   ;;  %1378 = vperm.xlu0 %1753, %v2289_v42   ;;  %v1861_v59 = vmov 19  }
 0x83a   :  { %1752 = vset.pattern.permute.xlu1 %v1858_v30  ;;  %1755 = vset.pattern.permute.xlu0 %v1859_v56  ;;  %v1862_v30 = vmov 29  }
 0x83b   :  { %1372 = vperm.xlu1 %1752, %v2287_v18   ;;  %1396 = vperm.xlu0 %1755, %v2287_v18  }
 0x83f   :  { %1754 = vset.pattern.permute.xlu1 %v1860_v44  ;;  %1758 = vset.pattern.permute.xlu0 %v1836_v40 }
 0x840   :  { %1384 = vperm.xlu1 %1754, %v2287_v18  }
 0x844   :  { %1390 = vperm.xlu1 %1754, %v2289_v42  }
 0x848   :  { %1756 = vset.pattern.permute.xlu1 %v1859_v56  ;;  %v1863_v56 = vmov 9  }
 0x849   :  { %1402 = vperm.xlu1 %1756, %v2289_v42  }
 0x84d   :  { %1757 = vset.pattern.permute.xlu1 %v1824_v0 }
 0x8ab   :  { %v1342_v54 = vpop.permute.xlu0 %1341  ;;  %v1348_v58 = vpop.permute.xlu1 %1347 }
 0x8ac   :  { %v1344_v37 = vmul.f32 %v1342_v54, %v2348_v15  ;;  %v1350_v50 = vmul.f32 %v1348_v58, %v2352_v1 }
 0x8ae   :  { %v1345_v28 = vadd.f32 %v1344_v37, %v1338_v57 }
 0x8b0   :  { %v1351_v2 = vadd.f32 %v1350_v50, %v1345_v28  ;;  %v1360_v9 = vpop.permute.xlu0 %1359  ;;  %v1354_v5 = vpop.permute.xlu1 %1353 }
 0x8b1   :  { %v1356_v49 = vmul.f32 %v1354_v5, %v2355_v14  ;;  %v1362_v20 = vmul.f32 %v1360_v9, %v2360_v24 }
 0x8b3   :  { %v1357_v48 = vadd.f32 %v1356_v49, %v1351_v2 }
 0x8b5   :  { %v1363_v22 = vadd.f32 %v1362_v20, %v1357_v48  ;;  %v1366_v29 = vpop.permute.xlu1 %1365  ;;  %v1379_v33 = vpop.permute.xlu0 %1378 }
 0x8b6   :  { %v1368_v21 = vmul.f32 %v1366_v29, %v2364_v60  ;;  %v1381_v25 = vmul.f32 %v1379_v33, %v2323_v19 }
 0x8b8   :  { %v1369_v16 = vadd.f32 %v1368_v21, %v1363_v22 }
 0x8ba   :  { %1816 = vtanh.f32 %v1369_v16  ;;  %v1373_v44 = vpop.permute.xlu1 %1372  ;;  %v1397_v17 = vpop.permute.xlu0 %1396 }
 0x8bb   :  { %v1375_v43 = vmul.f32 %v1373_v44, %v2314_v26  ;;  %v1399_v45 = vmul.f32 %v1397_v17, %v2337_v61 }
 0x8bd   :  { %v1376_v35 = vadd.f32 %v1375_v43, %v2320_v53 }
 0x8bf   :  { %v1385_v31 = vpop.permute.xlu1 %1384  ;;  %v1382_v23 = vadd.f32 %v1381_v25, %v1376_v35 }
 0x8c0   :  { %v1387_v63 = vmul.f32 %v1385_v31, %v2327_v3 }
 0x8c2   :  { %v1388_v4 = vadd.f32 %v1387_v63, %v1382_v23 }
 0x8c3   :  { %v1391_v13 = vpop.permute.xlu1 %1390 }
 0x8c4   :  { %v1817_v27 = vpop.eup %1816 }
 0x8c5   :  { %1415 = vperm.xlu0 %1758, %v1817_v27   ;;  %1409 = vperm.xlu1 %1757, %v1817_v27  }
 0x8c8   :  { %v1403_v51 = vpop.permute.xlu1 %1402 }
 0x8c9   :  { %1761 = vset.pattern.permute.xlu0 %v1842_v38  ;;  %1759 = vset.pattern.permute.xlu1 %v1840_v62  ;;  %v1405_v6 = vmul.f32 %v1403_v51, %v2345_v12 }
 0x8ca   :  { %1433 = vperm.xlu0 %1761, %v1817_v27   ;;  %1421 = vperm.xlu1 %1759, %v1817_v27  }
 0x8ce   :  { %1763 = vset.pattern.permute.xlu0 %v1861_v59  ;;  %1760 = vset.pattern.permute.xlu1 %v1841_v11 }
 0x8cf   :  { %1452 = vperm.xlu0 %1763, %v2287_v18   ;;  %1427 = vperm.xlu1 %1760, %v1817_v27  }
 0x8d3   :  { %1766 = vset.pattern.permute.xlu0 %v1862_v30  ;;  %1762 = vset.pattern.permute.xlu1 %v1863_v56 }
 0x8d4   :  { %1470 = vperm.xlu0 %1766, %v2289_v42   ;;  %1440 = vperm.xlu1 %1762, %v2287_v18  }
 0x8d8   :  { %1446 = vperm.xlu1 %1762, %v2289_v42   ;;  %1769 = vset.pattern.permute.xlu0 %v1840_v62 }
 0x8dc   :  { %1764 = vset.pattern.permute.xlu1 %v1861_v59 }
 0x8dd   :  { %1458 = vperm.xlu1 %1764, %v2289_v42   ;;  %v1393_v42 = vmul.f32 %v1391_v13, %v2332_v47 }
 0x8e1   :  { %1765 = vset.pattern.permute.xlu1 %v1862_v30 }
 0x8e2   :  { %1464 = vperm.xlu1 %1765, %v2287_v18   ;;  %v1394_v18 = vadd.f32 %v1393_v42, %v1388_v4 }
 0x8e4   :  { %v1400_v46 = vadd.f32 %v1399_v45, %v1394_v18 }
 0x8e6   :  { %1767 = vset.pattern.permute.xlu1 %v1824_v0  ;;  %v1406_v52 = vadd.f32 %v1405_v6, %v1400_v46 }
 0x944   :  { %v1410_v55 = vpop.permute.xlu1 %1409  ;;  %v1416_v54 = vpop.permute.xlu0 %1415 }
 0x945   :  { %v1412_v34 = vmul.f32 %v1410_v55, %v2348_v15  ;;  %v1418_v57 = vmul.f32 %v1416_v54, %v2352_v1 }
 0x947   :  { %v1413_v58 = vadd.f32 %v1412_v34, %v1406_v52 }
 0x949   :  { %v1422_v37 = vpop.permute.xlu1 %1421  ;;  %v1419_v28 = vadd.f32 %v1418_v57, %v1413_v58  ;;  %v1434_v2 = vpop.permute.xlu0 %1433 }
 0x94a   :  { %v1424_v50 = vmul.f32 %v1422_v37, %v2355_v14  ;;  %v1436_v20 = vmul.f32 %v1434_v2, %v2364_v60 }
 0x94c   :  { %v1425_v5 = vadd.f32 %v1424_v50, %v1419_v28 }
 0x94e   :  { %v1428_v9 = vpop.permute.xlu1 %1427  ;;  %v1453_v44 = vpop.permute.xlu0 %1452 }
 0x94f   :  { %v1430_v49 = vmul.f32 %v1428_v9, %v2360_v24  ;;  %v1455_v43 = vmul.f32 %v1453_v44, %v2327_v3 }
 0x951   :  { %v1431_v48 = vadd.f32 %v1430_v49, %v1425_v5 }
 0x953   :  { %v1437_v22 = vadd.f32 %v1436_v20, %v1431_v48  ;;  %v1441_v21 = vpop.permute.xlu1 %1440  ;;  %v1471_v13 = vpop.permute.xlu0 %1470 }
 0x954   :  { %v1443_v27 = vmul.f32 %v1441_v21, %v2314_v26  ;;  %v1473_v26 = vmul.f32 %v1471_v13, %v2345_v12 }
 0x955   :  { %1818 = vtanh.f32 %v1437_v22 }
 0x956   :  { %v1444_v56 = vadd.f32 %v1443_v27, %v2320_v53 }
 0x957   :  { %v1447_v16 = vpop.permute.xlu1 %1446 }
 0x958   :  { %v1449_v59 = vmul.f32 %v1447_v16, %v2323_v19 }
 0x95c   :  { %v1459_v30 = vpop.permute.xlu1 %1458 }
 0x95d   :  { %v1461_v35 = vmul.f32 %v1459_v30, %v2332_v47 }
 0x95f   :  { %v1819_v29 = vpop.eup %1818 }
 0x960   :  { %1489 = vperm.xlu0 %1769, %v1819_v29   ;;  %1477 = vperm.xlu1 %1767, %v1819_v29  }
 0x961   :  { %v1465_v31 = vpop.permute.xlu1 %1464 }
 0x962   :  { %v1467_v25 = vmul.f32 %v1465_v31, %v2337_v61 }
 0x964   :  { %1768 = vset.pattern.permute.xlu1 %v1836_v40  ;;  %1772 = vset.pattern.permute.xlu0 %v1824_v0  ;;  %v1450_v0 = vadd.f32 %v1449_v59, %v1444_v56 }
 0x965   :  { %1483 = vperm.xlu1 %1768, %v1819_v29  }
 0x966   :  { %v1456_v33 = vadd.f32 %v1455_v43, %v1450_v0 }
 0x969   :  { %1770 = vset.pattern.permute.xlu1 %v1841_v11 }
 0x96a   :  { %1495 = vperm.xlu1 %1770, %v1819_v29  }
 0x96e   :  { %1771 = vset.pattern.permute.xlu1 %v1842_v38 }
 0x96f   :  { %1501 = vperm.xlu1 %1771, %v1819_v29  }
 0x973   :  { %1773 = vset.pattern.permute.xlu1 %v1836_v40  ;;  %v1462_v40 = vadd.f32 %v1461_v35, %v1456_v33 }
 0x975   :  { %v1468_v23 = vadd.f32 %v1467_v25, %v1462_v40 }
 0x977   :  { %v1474_v42 = vadd.f32 %v1473_v26, %v1468_v23 }
 0x9df   :  { %v1478_v63 = vpop.permute.xlu1 %1477  ;;  %v1490_v3 = vpop.permute.xlu0 %1489 }
 0x9e0   :  { %v1480_v19 = vmul.f32 %v1478_v63, %v2348_v15  ;;  %v1492_v51 = vmul.f32 %v1490_v3, %v2355_v14 }
 0x9e2   :  { %v1481_v4 = vadd.f32 %v1480_v19, %v1474_v42 }
 0x9e4   :  { %v1484_v53 = vpop.permute.xlu1 %1483 }
 0x9e5   :  { %v1486_v17 = vmul.f32 %v1484_v53, %v2352_v1  ;;  %v21_v1 = vld [vmem:[%s2594_s3 + $0x20] sm:$0x1f] }
 0x9e6   :  { %v1514_v14 = vrot.slane %v21_v1, %v1910_v8  ;;  %v1545_v57 = vrot.slane %v21_v1, %v2185_v39  ;;  %v1555_v50 = vrot.slane %v21_v1, %v2311_v32 }
 0x9e7   :  { %v1487_v18 = vadd.f32 %v1486_v17, %v1481_v4 }
 0x9e9   :  { %v1496_v47 = vpop.permute.xlu1 %1495  ;;  %v1493_v45 = vadd.f32 %v1492_v51, %v1487_v18 }
 0x9ea   :  { %v1498_v61 = vmul.f32 %v1496_v47, %v2360_v24  ;;  %v1525_v24 = vrot.slane %v21_v1, %v1918_v10 }
 0x9ec   :  { %v1499_v6 = vadd.f32 %v1498_v61, %v1493_v45 }
 0x9ee   :  { %v1502_v46 = vpop.permute.xlu1 %1501 }
 0x9ef   :  { %v1504_v55 = vmul.f32 %v1502_v46, %v2364_v60  ;;  %v1823_v60 = vld [vmem:[%s2594_s3] sm:$0xff] }
 0x9f1   :  { %v1505_v12 = vadd.f32 %v1504_v55, %v1499_v6 }
 0x9f3   :  { %1820 = vtanh.f32 %v1505_v12 }
 0x9fd   :  { %v1821_v15 = vpop.eup %1820 }
 0x9fe   :  { %1527 = vperm.xlu1 %1773, %v1821_v15   ;;  %1517 = vperm.xlu0 %1772, %v1821_v15  }
 0xa02   :  { %1774 = vset.pattern.permute.xlu1 %v1840_v62  ;;  %1775 = vset.pattern.permute.xlu0 %v1841_v11  ;;  %v1510_v62 = vrot.slane %v1823_v60, %v820_v36 }
 0xa03   :  { %1537 = vperm.xlu1 %1774, %v1821_v15   ;;  %1547 = vperm.xlu0 %1775, %v1821_v15  }
 0xa07   :  { %1776 = vset.pattern.permute.xlu1 %v1842_v38  ;;  %1777 = vset.pattern.permute.xlu0 %v1842_v38  ;;  %v1535_v38 = vrot.slane %v21_v1, %v2259_v41 }
 0xa08   :  { %1557 = vperm.xlu1 %1776, %v1821_v15  }
 0xa7d   :  { %v1528_v11 = vpop.permute.xlu1 %1527  ;;  %v1518_v52 = vpop.permute.xlu0 %1517 }
 0xa7e   :  { %v1520_v34 = vmul.f32 %v1518_v52, %v1514_v14  ;;  %v1530_v54 = vmul.f32 %v1528_v11, %v1525_v24 }
 0xa80   :  { %v1521_v58 = vadd.f32 %v1520_v34, %v1510_v62 }
 0xa82   :  { %v1538_v37 = vpop.permute.xlu1 %1537  ;;  %v1531_v8 = vadd.f32 %v1530_v54, %v1521_v58  ;;  %v1548_v28 = vpop.permute.xlu0 %1547 }
 0xa83   :  { %v1540_v10 = vmul.f32 %v1538_v37, %v1535_v38  ;;  %v1550_v9 = vmul.f32 %v1548_v28, %v1545_v57 }
 0xa85   :  { %v1541_v2 = vadd.f32 %v1540_v10, %v1531_v8 }
 0xa87   :  { %v1551_v5 = vadd.f32 %v1550_v9, %v1541_v2  ;;  %v1558_v7 = vpop.permute.xlu1 %1557 }
 0xa88   :  { %v1560_v36 = vmul.f32 %v1558_v7, %v1555_v50 }
 0xa8a   :  { %v1561_v49 = vadd.f32 %v1560_v36, %v1551_v5 }
 0xa8c   :  { %1563 = vst.msk [vmem:[%s2597_s4] sm:$0x3] %vm1562_vm15, %v1561_v49 }

</bundles_post_ra>
